<compile_context>
chip_gen: v7x
topology: tpu7x:2x2x1
jax: 0.10.0
libtpu: 0.0.40
codegen_flags: <defaults>
</compile_context>

<pallas_src>
import numpy as np
import jax
import jax.numpy as jnp
from jax.experimental import pallas as pl
from jax.experimental.pallas import tpu as pltpu

NEG_SLOPE = 0.01                 # torch nn.LeakyReLU default
KSIZE, STRIDE, PAD = 5, 2, 2


def _leaky_relu(v):
    return jnp.where(v > 0, v, NEG_SLOPE * v)


def _conv_out(n):
    return (n + 2 * PAD - KSIZE) // STRIDE + 1


# ---------------------------------------------------------------------------
# Constant 0/1 selection matrices (shape-only; built in numpy at trace time).
# ---------------------------------------------------------------------------
def _row_select(batch, h_in, h_out):
    """L[kh]: (batch*h_out, batch*h_in); row (n, oh) picks input row
    (n, 2*oh + kh - 2), or is all-zero when that row falls in the padding."""
    L = np.zeros((KSIZE, batch * h_out, batch * h_in), np.float32)
    for kh in range(KSIZE):
        for n in range(batch):
            for oh in range(h_out):
                h = STRIDE * oh + kh - PAD
                if 0 <= h < h_in:
                    L[kh, n * h_out + oh, n * h_in + h] = 1.0
    return L


def _col_select(w_in, w_out):
    """S[kw, w, ow] = 1 iff w == 2*ow + kw - 2 (column tap, with padding)."""
    S = np.zeros((KSIZE, w_in, w_out), np.float32)
    for kw in range(KSIZE):
        for ow in range(w_out):
            w = STRIDE * ow + kw - PAD
            if 0 <= w < w_in:
                S[kw, w, ow] = 1.0
    return S


def _feat_select(batch, h_out):
    """E[oh]: (batch, batch*h_out); picks activation row (n, oh)."""
    E = np.zeros((h_out, batch, batch * h_out), np.float32)
    for oh in range(h_out):
        for n in range(batch):
            E[oh, n, n * h_out + oh] = 1.0
    return E


# ---------------------------------------------------------------------------
# The single fused kernel: conv tower + joint FC head, all data in VMEM.
# ---------------------------------------------------------------------------
def _fused_disc_kernel(a0_ref, z_ref,
                       l1_ref, r1_ref, cb1_ref,
                       l2_ref, r2_ref, cb2_ref,
                       l3_ref, r3_ref, cb3_ref,
                       e_ref, w1a_ref, w1z_ref, fb1_ref, fw2_ref, fb2_ref,
                       out_ref):
    act = a0_ref[...]                     # (N*H0, W0*C0), bf16
    compute_dtype = act.dtype

    def conv_layer(a, l_ref, r_ref, b_ref):
        acc = None
        for kh in range(KSIZE):           # static unroll: 5 row taps
            rows = jnp.dot(l_ref[kh], a, preferred_element_type=jnp.float32)
            # 0/1 row selection of bf16 data -> cast back is lossless.
            rows = rows.astype(compute_dtype)
            term = jnp.dot(rows, r_ref[kh],
                           preferred_element_type=jnp.float32)
            acc = term if acc is None else acc + term
        acc = _leaky_relu(acc + b_ref[...].astype(jnp.float32))
        return acc.astype(compute_dtype)

    act = conv_layer(act, l1_ref, r1_ref, cb1_ref)   # (N*OH1, OW1*C1)
    act = conv_layer(act, l2_ref, r2_ref, cb2_ref)   # (N*OH2, OW2*C2)
    act = conv_layer(act, l3_ref, r3_ref, cb3_ref)   # (N*OH3, OW3*C3)

    # Joint FC head: concat([flatten(act), z]) is fused via split weights;
    # the NCHW flatten permutation is already folded into w1a.
    h = jnp.dot(z_ref[...], w1z_ref[...], preferred_element_type=jnp.float32)
    for oh in range(e_ref.shape[0]):       # static unroll over feature rows
        rows = jnp.dot(e_ref[oh], act,
                       preferred_element_type=jnp.float32).astype(compute_dtype)
        h = h + jnp.dot(rows, w1a_ref[oh], preferred_element_type=jnp.float32)
    h = _leaky_relu(h + fb1_ref[...].astype(jnp.float32))        # (B, fc_dim)

    # fc2 (fc_dim -> 1): VPU multiply + lane reduction; scalar bias in SMEM.
    w2 = fw2_ref[...].astype(jnp.float32)                        # (1, fc_dim)
    out = jnp.sum(h * w2, axis=-1, keepdims=True) + fb2_ref[0]
    # TODO(synk): at large batch, emit a lane-dense (1, B) result instead of
    # the (B, 1) column to avoid masked partial stores (negligible at B=4).
    out_ref[...] = out.astype(out_ref.dtype)


# ---------------------------------------------------------------------------
# Wrapper: builds the constant selection matrices / band weights and makes a
# single pallas_call for the whole forward pass.
# ---------------------------------------------------------------------------
@jax.jit
def dc_joint_discriminator(x_nchw, z, params):
    """x_nchw: (B, C, H, W), z: (B, latent_dim) -> sxz: (B, 1) f32."""
    compute_dtype = params["fc1_w"].dtype
    B, C0, H0, W0 = x_nchw.shape

    # Activation layout used by the kernel: rows = (n, h), lanes = (w, c).
    a0 = jnp.transpose(x_nchw, (0, 2, 3, 1)).reshape(B * H0, W0 * C0)
    args = [a0.astype(compute_dtype), z.astype(compute_dtype)]

    flops = 0
    h_in, w_in, c_in = H0, W0, C0
    for w, b in params["conv"]:
        k, _, cin, cout = w.shape
        assert (k, cin) == (KSIZE, c_in)
        h_out, w_out = _conv_out(h_in), _conv_out(w_in)
        L = jnp.asarray(_row_select(B, h_in, h_out), compute_dtype)
        # Scatter the 5x5xCinxCout conv weight into 5 band matrices R[kh]:
        # R[kh, w*Cin+ci, ow*Cout+co] = W[kh, kw, ci, co] with w = 2*ow+kw-2.
        S = jnp.asarray(_col_select(w_in, w_out))
        R = jnp.einsum('kwo,hkic->hwioc', S, w.astype(jnp.float32))
        R = R.reshape(KSIZE, w_in * c_in, w_out * cout).astype(compute_dtype)
        brow = jnp.tile(b.astype(jnp.float32), (w_out,)).reshape(1, -1)
        args += [L, R, brow]
        flops += KSIZE * 2 * (B * h_out) * ((B * h_in) + (w_out * cout)) \
                 * (w_in * c_in)
        h_in, w_in, c_in = h_out, w_out, cout
        # TODO(synk): for large image sizes the dense R_kh band matrices grow
        # as O((W*Cin)*(OW*Cout)); switch to an in-kernel strided DMA row-band
        # gather for big feature maps instead of the matmul-gather used here.

    # FC head: fold the torch NCHW flatten permutation into the fc1 weight.
    feat_dim = c_in * h_in * w_in
    fc1_w = params["fc1_w"]
    fc_dim = fc1_w.shape[1]
    w1a = fc1_w[:feat_dim].reshape(c_in, h_in, w_in, fc_dim)
    w1a = jnp.transpose(w1a, (1, 2, 0, 3)).reshape(h_in, w_in * c_in, fc_dim)
    w1z = fc1_w[feat_dim:]
    E = jnp.asarray(_feat_select(B, h_in), compute_dtype)
    fb1 = params["fc1_b"].reshape(1, -1).astype(jnp.float32)
    fw2 = params["fc2_w"].reshape(1, -1).astype(compute_dtype)
    fb2 = params["fc2_b"].reshape(1).astype(jnp.float32)        # SMEM scalar
    args += [E, w1a.astype(compute_dtype), w1z.astype(compute_dtype),
             fb1, fw2, fb2]
    flops += 2 * B * (feat_dim + int(w1z.shape[0])) * fc_dim + 4 * B * fc_dim

    bytes_accessed = int(sum(int(np.prod(a.shape)) * a.dtype.itemsize
                             for a in args) + B * 4)
    # Explicit VMEM budget (whole problem is << 1 MiB at this config; keep a
    # comfortable margin, capped below v7x's 64 MiB physical VMEM).
    vmem_limit = int(min(64 * 2**20, max(16 * 2**20, 8 * bytes_accessed)))

    in_specs = ([pl.BlockSpec(memory_space=pltpu.MemorySpace.VMEM)]
                * (len(args) - 1)
                + [pl.BlockSpec(memory_space=pltpu.MemorySpace.SMEM)])

    # Single grid step: at these sizes per-step overhead dominates, so no
    # forced multi-step split.
    # TODO(synk): for large batch, grid over batch rows with
    # dimension_semantics=("parallel",) to engage both v7x TensorCores.
    out = pl.pallas_call(
        _fused_disc_kernel,
        out_shape=jax.ShapeDtypeStruct((B, 1), jnp.float32),
        in_specs=in_specs,
        out_specs=pl.BlockSpec(memory_space=pltpu.MemorySpace.VMEM),
        compiler_params=pltpu.CompilerParams(vmem_limit_bytes=vmem_limit),
        cost_estimate=pl.CostEstimate(flops=int(flops), transcendentals=0,
                                      bytes_accessed=bytes_accessed),
    )(*args)
    return out


# ---------------------------------------------------------------------------
# Pure-JAX reference (standard conv / concat / linear ops) mirroring the
# kernel's dtype policy: bf16 matmul operands, f32 accumulation & elementwise.
# ---------------------------------------------------------------------------
def _reference(x_nchw, z, params):
    compute_dtype = params["fc1_w"].dtype
    B = x_nchw.shape[0]
    h = jnp.transpose(x_nchw, (0, 2, 3, 1)).astype(compute_dtype)
    for w, b in params["conv"]:
        y = jax.lax.conv_general_dilated(
            h, w, window_strides=(STRIDE, STRIDE),
            padding=((PAD, PAD), (PAD, PAD)),
            dimension_numbers=("NHWC", "HWIO", "NHWC"),
            preferred_element_type=jnp.float32)
        h = _leaky_relu(y + b.reshape(1, 1, 1, -1)).astype(compute_dtype)
    feat = jnp.transpose(h, (0, 3, 1, 2)).reshape(B, -1)         # NCHW flatten
    xz = jnp.concatenate([feat, z.astype(compute_dtype)], axis=1)
    h1 = jnp.dot(xz, params["fc1_w"], preferred_element_type=jnp.float32)
    h1 = _leaky_relu(h1 + params["fc1_b"].reshape(1, -1))
    out = jnp.dot(h1, params["fc2_w"].astype(jnp.float32).reshape(-1, 1))
    return out + params["fc2_b"].reshape(1, 1)


if __name__ == "__main__":
    # Small config consistent with the module: image_channel=3, conv_dim=8,
    # image_size=32 (final feature map 4x4, matching the module's
    # conv_dim*4*4*4 fc_in formula), latent_dim=16, fc_dim=128.
    B, IC, IMG = 4, 3, 32
    CONV_DIM, LATENT_DIM, FC_DIM = 8, 16, 128
    COMPUTE_DTYPE = jnp.bfloat16   # matmul operand dtype (f32 accumulation)

    key = jax.random.PRNGKey(0)
    keys = jax.random.split(key, 12)

    x = jax.random.normal(keys[0], (B, IC, IMG, IMG), jnp.float32)
    z = jax.random.normal(keys[1], (B, LATENT_DIM), jnp.float32)

    chans = [IC, CONV_DIM, CONV_DIM * 2, CONV_DIM * 4]
    conv_params = []
    for li in range(3):
        # HWIO layout; a real torch port permutes OIHW -> HWIO first.
        w = (jax.random.normal(keys[2 + 2 * li],
                               (5, 5, chans[li], chans[li + 1]),
                               jnp.float32) * 0.1).astype(COMPUTE_DTYPE)
        b = jax.random.normal(keys[3 + 2 * li], (chans[li + 1],),
                              jnp.float32) * 0.1
        conv_params.append((w, b))

    feat_dim = chans[-1] * (IMG // 8) * (IMG // 8)        # 32 * 4 * 4 = 512
    fc_in = feat_dim + LATENT_DIM
    params = {
        "conv": conv_params,
        # fc weights stored (in, out); first feat_dim rows follow the torch
        # NCHW flatten order (c, h, w), then the latent rows.
        "fc1_w": (jax.random.normal(keys[8], (fc_in, FC_DIM), jnp.float32)
                  * 0.1).astype(COMPUTE_DTYPE),
        "fc1_b": jax.random.normal(keys[9], (FC_DIM,), jnp.float32) * 0.1,
        "fc2_w": (jax.random.normal(keys[10], (FC_DIM,), jnp.float32)
                  * 0.1).astype(COMPUTE_DTYPE),
        "fc2_b": jax.random.normal(keys[11], (1,), jnp.float32) * 0.1,
    }

    out = dc_joint_discriminator(x, z, params)
    jax.block_until_ready(out)

    ref = _reference(x, z, params)
    assert out.shape == (B, 1), out.shape
    max_err = float(jnp.max(jnp.abs(out - ref)))
    assert jnp.allclose(out, ref, atol=5e-3, rtol=2e-2), max_err
    print("KERNEL_OK")
</pallas_src>

<mosaic_0001>
module attributes {stable_mosaic.version = 11 : i64} {
  func.func @_fused_disc_kernel(%arg0: memref<128x96xbf16, #tpu.memory_space<vmem>>, %arg1: memref<4x16xbf16, #tpu.memory_space<vmem>>, %arg2: memref<5x64x128xbf16, #tpu.memory_space<vmem>>, %arg3: memref<5x96x128xbf16, #tpu.memory_space<vmem>>, %arg4: memref<1x128xf32, #tpu.memory_space<vmem>>, %arg5: memref<5x32x64xbf16, #tpu.memory_space<vmem>>, %arg6: memref<5x128x128xbf16, #tpu.memory_space<vmem>>, %arg7: memref<1x128xf32, #tpu.memory_space<vmem>>, %arg8: memref<5x16x32xbf16, #tpu.memory_space<vmem>>, %arg9: memref<5x128x128xbf16, #tpu.memory_space<vmem>>, %arg10: memref<1x128xf32, #tpu.memory_space<vmem>>, %arg11: memref<4x4x16xbf16, #tpu.memory_space<vmem>>, %arg12: memref<4x128x128xbf16, #tpu.memory_space<vmem>>, %arg13: memref<16x128xbf16, #tpu.memory_space<vmem>>, %arg14: memref<1x128xf32, #tpu.memory_space<vmem>>, %arg15: memref<1x128xbf16, #tpu.memory_space<vmem>>, %arg16: memref<1xf32, #tpu.memory_space<smem>>, %arg17: memref<4x1xf32, #tpu.memory_space<vmem>>) attributes {dimension_semantics = [], scalar_prefetch = 0 : i64, scratch_operands = 0 : i64, tpu.core_type = #tpu.core_type<tc>} {
    %c0 = arith.constant 0 : index
    %c0_0 = arith.constant 0 : index
    %0 = vector.load %arg0[%c0, %c0_0] : memref<128x96xbf16, #tpu.memory_space<vmem>>, vector<128x96xbf16>
    %c0_1 = arith.constant 0 : index
    %c0_2 = arith.constant 0 : index
    %c0_3 = arith.constant 0 : index
    %1 = vector.load %arg2[%c0_1, %c0_2, %c0_3] : memref<5x64x128xbf16, #tpu.memory_space<vmem>>, vector<1x64x128xbf16>
    %2 = vector.shape_cast %1 : vector<1x64x128xbf16> to vector<64x128xbf16>
    %cst = arith.constant dense<0.000000e+00> : vector<64x96xf32>
    %3 = tpu.matmul %2, %0, %cst {dimension_numbers = #tpu.dot_dimension_numbers<[1], [0], [0], [1], [0, 0, 1, 1], [], []>} : vector<64x128xbf16>, vector<128x96xbf16>, vector<64x96xf32> -> vector<64x96xf32>
    %4 = arith.truncf %3 : vector<64x96xf32> to vector<64x96xbf16>
    %c0_4 = arith.constant 0 : index
    %c0_5 = arith.constant 0 : index
    %c0_6 = arith.constant 0 : index
    %5 = vector.load %arg3[%c0_4, %c0_5, %c0_6] : memref<5x96x128xbf16, #tpu.memory_space<vmem>>, vector<1x96x128xbf16>
    %6 = vector.shape_cast %5 : vector<1x96x128xbf16> to vector<96x128xbf16>
    %cst_7 = arith.constant dense<0.000000e+00> : vector<64x128xf32>
    %7 = tpu.matmul %4, %6, %cst_7 {dimension_numbers = #tpu.dot_dimension_numbers<[1], [0], [0], [1], [0, 0, 1, 1], [], []>} : vector<64x96xbf16>, vector<96x128xbf16>, vector<64x128xf32> -> vector<64x128xf32>
    %c1 = arith.constant 1 : index
    %c0_8 = arith.constant 0 : index
    %c0_9 = arith.constant 0 : index
    %8 = vector.load %arg2[%c1, %c0_8, %c0_9] : memref<5x64x128xbf16, #tpu.memory_space<vmem>>, vector<1x64x128xbf16>
    %9 = vector.shape_cast %8 : vector<1x64x128xbf16> to vector<64x128xbf16>
    %cst_10 = arith.constant dense<0.000000e+00> : vector<64x96xf32>
    %10 = tpu.matmul %9, %0, %cst_10 {dimension_numbers = #tpu.dot_dimension_numbers<[1], [0], [0], [1], [0, 0, 1, 1], [], []>} : vector<64x128xbf16>, vector<128x96xbf16>, vector<64x96xf32> -> vector<64x96xf32>
    %11 = arith.truncf %10 : vector<64x96xf32> to vector<64x96xbf16>
    %c1_11 = arith.constant 1 : index
    %c0_12 = arith.constant 0 : index
    %c0_13 = arith.constant 0 : index
    %12 = vector.load %arg3[%c1_11, %c0_12, %c0_13] : memref<5x96x128xbf16, #tpu.memory_space<vmem>>, vector<1x96x128xbf16>
    %13 = vector.shape_cast %12 : vector<1x96x128xbf16> to vector<96x128xbf16>
    %cst_14 = arith.constant dense<0.000000e+00> : vector<64x128xf32>
    %14 = tpu.matmul %11, %13, %cst_14 {dimension_numbers = #tpu.dot_dimension_numbers<[1], [0], [0], [1], [0, 0, 1, 1], [], []>} : vector<64x96xbf16>, vector<96x128xbf16>, vector<64x128xf32> -> vector<64x128xf32>
    %15 = arith.addf %7, %14 : vector<64x128xf32>
    %c2 = arith.constant 2 : index
    %c0_15 = arith.constant 0 : index
    %c0_16 = arith.constant 0 : index
    %16 = vector.load %arg2[%c2, %c0_15, %c0_16] : memref<5x64x128xbf16, #tpu.memory_space<vmem>>, vector<1x64x128xbf16>
    %17 = vector.shape_cast %16 : vector<1x64x128xbf16> to vector<64x128xbf16>
    %cst_17 = arith.constant dense<0.000000e+00> : vector<64x96xf32>
    %18 = tpu.matmul %17, %0, %cst_17 {dimension_numbers = #tpu.dot_dimension_numbers<[1], [0], [0], [1], [0, 0, 1, 1], [], []>} : vector<64x128xbf16>, vector<128x96xbf16>, vector<64x96xf32> -> vector<64x96xf32>
    %19 = arith.truncf %18 : vector<64x96xf32> to vector<64x96xbf16>
    %c2_18 = arith.constant 2 : index
    %c0_19 = arith.constant 0 : index
    %c0_20 = arith.constant 0 : index
    %20 = vector.load %arg3[%c2_18, %c0_19, %c0_20] : memref<5x96x128xbf16, #tpu.memory_space<vmem>>, vector<1x96x128xbf16>
    %21 = vector.shape_cast %20 : vector<1x96x128xbf16> to vector<96x128xbf16>
    %cst_21 = arith.constant dense<0.000000e+00> : vector<64x128xf32>
    %22 = tpu.matmul %19, %21, %cst_21 {dimension_numbers = #tpu.dot_dimension_numbers<[1], [0], [0], [1], [0, 0, 1, 1], [], []>} : vector<64x96xbf16>, vector<96x128xbf16>, vector<64x128xf32> -> vector<64x128xf32>
    %23 = arith.addf %15, %22 : vector<64x128xf32>
    %c3 = arith.constant 3 : index
    %c0_22 = arith.constant 0 : index
    %c0_23 = arith.constant 0 : index
    %24 = vector.load %arg2[%c3, %c0_22, %c0_23] : memref<5x64x128xbf16, #tpu.memory_space<vmem>>, vector<1x64x128xbf16>
    %25 = vector.shape_cast %24 : vector<1x64x128xbf16> to vector<64x128xbf16>
    %cst_24 = arith.constant dense<0.000000e+00> : vector<64x96xf32>
    %26 = tpu.matmul %25, %0, %cst_24 {dimension_numbers = #tpu.dot_dimension_numbers<[1], [0], [0], [1], [0, 0, 1, 1], [], []>} : vector<64x128xbf16>, vector<128x96xbf16>, vector<64x96xf32> -> vector<64x96xf32>
    %27 = arith.truncf %26 : vector<64x96xf32> to vector<64x96xbf16>
    %c3_25 = arith.constant 3 : index
    %c0_26 = arith.constant 0 : index
    %c0_27 = arith.constant 0 : index
    %28 = vector.load %arg3[%c3_25, %c0_26, %c0_27] : memref<5x96x128xbf16, #tpu.memory_space<vmem>>, vector<1x96x128xbf16>
    %29 = vector.shape_cast %28 : vector<1x96x128xbf16> to vector<96x128xbf16>
    %cst_28 = arith.constant dense<0.000000e+00> : vector<64x128xf32>
    %30 = tpu.matmul %27, %29, %cst_28 {dimension_numbers = #tpu.dot_dimension_numbers<[1], [0], [0], [1], [0, 0, 1, 1], [], []>} : vector<64x96xbf16>, vector<96x128xbf16>, vector<64x128xf32> -> vector<64x128xf32>
    %31 = arith.addf %23, %30 : vector<64x128xf32>
    %c4 = arith.constant 4 : index
    %c0_29 = arith.constant 0 : index
    %c0_30 = arith.constant 0 : index
    %32 = vector.load %arg2[%c4, %c0_29, %c0_30] : memref<5x64x128xbf16, #tpu.memory_space<vmem>>, vector<1x64x128xbf16>
    %33 = vector.shape_cast %32 : vector<1x64x128xbf16> to vector<64x128xbf16>
    %cst_31 = arith.constant dense<0.000000e+00> : vector<64x96xf32>
    %34 = tpu.matmul %33, %0, %cst_31 {dimension_numbers = #tpu.dot_dimension_numbers<[1], [0], [0], [1], [0, 0, 1, 1], [], []>} : vector<64x128xbf16>, vector<128x96xbf16>, vector<64x96xf32> -> vector<64x96xf32>
    %35 = arith.truncf %34 : vector<64x96xf32> to vector<64x96xbf16>
    %c4_32 = arith.constant 4 : index
    %c0_33 = arith.constant 0 : index
    %c0_34 = arith.constant 0 : index
    %36 = vector.load %arg3[%c4_32, %c0_33, %c0_34] : memref<5x96x128xbf16, #tpu.memory_space<vmem>>, vector<1x96x128xbf16>
    %37 = vector.shape_cast %36 : vector<1x96x128xbf16> to vector<96x128xbf16>
    %cst_35 = arith.constant dense<0.000000e+00> : vector<64x128xf32>
    %38 = tpu.matmul %35, %37, %cst_35 {dimension_numbers = #tpu.dot_dimension_numbers<[1], [0], [0], [1], [0, 0, 1, 1], [], []>} : vector<64x96xbf16>, vector<96x128xbf16>, vector<64x128xf32> -> vector<64x128xf32>
    %39 = arith.addf %31, %38 : vector<64x128xf32>
    %c0_36 = arith.constant 0 : index
    %c0_37 = arith.constant 0 : index
    %40 = vector.load %arg4[%c0_36, %c0_37] : memref<1x128xf32, #tpu.memory_space<vmem>>, vector<1x128xf32>
    %41 = vector.broadcast %40 : vector<1x128xf32> to vector<64x128xf32>
    %42 = arith.addf %39, %41 : vector<64x128xf32>
    %cst_38 = arith.constant 0.000000e+00 : f32
    %43 = vector.broadcast %cst_38 : f32 to vector<64x128xf32>
    %44 = arith.cmpf ogt, %42, %43 : vector<64x128xf32>
    %cst_39 = arith.constant 0.00999999977 : f32
    %45 = vector.broadcast %cst_39 : f32 to vector<64x128xf32>
    %46 = arith.mulf %45, %42 : vector<64x128xf32>
    %47 = arith.select %44, %42, %46 : vector<64x128xi1>, vector<64x128xf32>
    %48 = arith.truncf %47 : vector<64x128xf32> to vector<64x128xbf16>
    %c0_40 = arith.constant 0 : index
    %c0_41 = arith.constant 0 : index
    %c0_42 = arith.constant 0 : index
    %49 = vector.load %arg5[%c0_40, %c0_41, %c0_42] : memref<5x32x64xbf16, #tpu.memory_space<vmem>>, vector<1x32x64xbf16>
    %50 = vector.shape_cast %49 : vector<1x32x64xbf16> to vector<32x64xbf16>
    %cst_43 = arith.constant dense<0.000000e+00> : vector<32x128xf32>
    %51 = tpu.matmul %50, %48, %cst_43 {dimension_numbers = #tpu.dot_dimension_numbers<[1], [0], [0], [1], [0, 0, 1, 1], [], []>} : vector<32x64xbf16>, vector<64x128xbf16>, vector<32x128xf32> -> vector<32x128xf32>
    %52 = arith.truncf %51 : vector<32x128xf32> to vector<32x128xbf16>
    %c0_44 = arith.constant 0 : index
    %c0_45 = arith.constant 0 : index
    %c0_46 = arith.constant 0 : index
    %53 = vector.load %arg6[%c0_44, %c0_45, %c0_46] : memref<5x128x128xbf16, #tpu.memory_space<vmem>>, vector<1x128x128xbf16>
    %54 = vector.shape_cast %53 : vector<1x128x128xbf16> to vector<128x128xbf16>
    %cst_47 = arith.constant dense<0.000000e+00> : vector<32x128xf32>
    %55 = tpu.matmul %52, %54, %cst_47 {dimension_numbers = #tpu.dot_dimension_numbers<[1], [0], [0], [1], [0, 0, 1, 1], [], []>} : vector<32x128xbf16>, vector<128x128xbf16>, vector<32x128xf32> -> vector<32x128xf32>
    %c1_48 = arith.constant 1 : index
    %c0_49 = arith.constant 0 : index
    %c0_50 = arith.constant 0 : index
    %56 = vector.load %arg5[%c1_48, %c0_49, %c0_50] : memref<5x32x64xbf16, #tpu.memory_space<vmem>>, vector<1x32x64xbf16>
    %57 = vector.shape_cast %56 : vector<1x32x64xbf16> to vector<32x64xbf16>
    %cst_51 = arith.constant dense<0.000000e+00> : vector<32x128xf32>
    %58 = tpu.matmul %57, %48, %cst_51 {dimension_numbers = #tpu.dot_dimension_numbers<[1], [0], [0], [1], [0, 0, 1, 1], [], []>} : vector<32x64xbf16>, vector<64x128xbf16>, vector<32x128xf32> -> vector<32x128xf32>
    %59 = arith.truncf %58 : vector<32x128xf32> to vector<32x128xbf16>
    %c1_52 = arith.constant 1 : index
    %c0_53 = arith.constant 0 : index
    %c0_54 = arith.constant 0 : index
    %60 = vector.load %arg6[%c1_52, %c0_53, %c0_54] : memref<5x128x128xbf16, #tpu.memory_space<vmem>>, vector<1x128x128xbf16>
    %61 = vector.shape_cast %60 : vector<1x128x128xbf16> to vector<128x128xbf16>
    %cst_55 = arith.constant dense<0.000000e+00> : vector<32x128xf32>
    %62 = tpu.matmul %59, %61, %cst_55 {dimension_numbers = #tpu.dot_dimension_numbers<[1], [0], [0], [1], [0, 0, 1, 1], [], []>} : vector<32x128xbf16>, vector<128x128xbf16>, vector<32x128xf32> -> vector<32x128xf32>
    %63 = arith.addf %55, %62 : vector<32x128xf32>
    %c2_56 = arith.constant 2 : index
    %c0_57 = arith.constant 0 : index
    %c0_58 = arith.constant 0 : index
    %64 = vector.load %arg5[%c2_56, %c0_57, %c0_58] : memref<5x32x64xbf16, #tpu.memory_space<vmem>>, vector<1x32x64xbf16>
    %65 = vector.shape_cast %64 : vector<1x32x64xbf16> to vector<32x64xbf16>
    %cst_59 = arith.constant dense<0.000000e+00> : vector<32x128xf32>
    %66 = tpu.matmul %65, %48, %cst_59 {dimension_numbers = #tpu.dot_dimension_numbers<[1], [0], [0], [1], [0, 0, 1, 1], [], []>} : vector<32x64xbf16>, vector<64x128xbf16>, vector<32x128xf32> -> vector<32x128xf32>
    %67 = arith.truncf %66 : vector<32x128xf32> to vector<32x128xbf16>
    %c2_60 = arith.constant 2 : index
    %c0_61 = arith.constant 0 : index
    %c0_62 = arith.constant 0 : index
    %68 = vector.load %arg6[%c2_60, %c0_61, %c0_62] : memref<5x128x128xbf16, #tpu.memory_space<vmem>>, vector<1x128x128xbf16>
    %69 = vector.shape_cast %68 : vector<1x128x128xbf16> to vector<128x128xbf16>
    %cst_63 = arith.constant dense<0.000000e+00> : vector<32x128xf32>
    %70 = tpu.matmul %67, %69, %cst_63 {dimension_numbers = #tpu.dot_dimension_numbers<[1], [0], [0], [1], [0, 0, 1, 1], [], []>} : vector<32x128xbf16>, vector<128x128xbf16>, vector<32x128xf32> -> vector<32x128xf32>
    %71 = arith.addf %63, %70 : vector<32x128xf32>
    %c3_64 = arith.constant 3 : index
    %c0_65 = arith.constant 0 : index
    %c0_66 = arith.constant 0 : index
    %72 = vector.load %arg5[%c3_64, %c0_65, %c0_66] : memref<5x32x64xbf16, #tpu.memory_space<vmem>>, vector<1x32x64xbf16>
    %73 = vector.shape_cast %72 : vector<1x32x64xbf16> to vector<32x64xbf16>
    %cst_67 = arith.constant dense<0.000000e+00> : vector<32x128xf32>
    %74 = tpu.matmul %73, %48, %cst_67 {dimension_numbers = #tpu.dot_dimension_numbers<[1], [0], [0], [1], [0, 0, 1, 1], [], []>} : vector<32x64xbf16>, vector<64x128xbf16>, vector<32x128xf32> -> vector<32x128xf32>
    %75 = arith.truncf %74 : vector<32x128xf32> to vector<32x128xbf16>
    %c3_68 = arith.constant 3 : index
    %c0_69 = arith.constant 0 : index
    %c0_70 = arith.constant 0 : index
    %76 = vector.load %arg6[%c3_68, %c0_69, %c0_70] : memref<5x128x128xbf16, #tpu.memory_space<vmem>>, vector<1x128x128xbf16>
    %77 = vector.shape_cast %76 : vector<1x128x128xbf16> to vector<128x128xbf16>
    %cst_71 = arith.constant dense<0.000000e+00> : vector<32x128xf32>
    %78 = tpu.matmul %75, %77, %cst_71 {dimension_numbers = #tpu.dot_dimension_numbers<[1], [0], [0], [1], [0, 0, 1, 1], [], []>} : vector<32x128xbf16>, vector<128x128xbf16>, vector<32x128xf32> -> vector<32x128xf32>
    %79 = arith.addf %71, %78 : vector<32x128xf32>
    %c4_72 = arith.constant 4 : index
    %c0_73 = arith.constant 0 : index
    %c0_74 = arith.constant 0 : index
    %80 = vector.load %arg5[%c4_72, %c0_73, %c0_74] : memref<5x32x64xbf16, #tpu.memory_space<vmem>>, vector<1x32x64xbf16>
    %81 = vector.shape_cast %80 : vector<1x32x64xbf16> to vector<32x64xbf16>
    %cst_75 = arith.constant dense<0.000000e+00> : vector<32x128xf32>
    %82 = tpu.matmul %81, %48, %cst_75 {dimension_numbers = #tpu.dot_dimension_numbers<[1], [0], [0], [1], [0, 0, 1, 1], [], []>} : vector<32x64xbf16>, vector<64x128xbf16>, vector<32x128xf32> -> vector<32x128xf32>
    %83 = arith.truncf %82 : vector<32x128xf32> to vector<32x128xbf16>
    %c4_76 = arith.constant 4 : index
    %c0_77 = arith.constant 0 : index
    %c0_78 = arith.constant 0 : index
    %84 = vector.load %arg6[%c4_76, %c0_77, %c0_78] : memref<5x128x128xbf16, #tpu.memory_space<vmem>>, vector<1x128x128xbf16>
    %85 = vector.shape_cast %84 : vector<1x128x128xbf16> to vector<128x128xbf16>
    %cst_79 = arith.constant dense<0.000000e+00> : vector<32x128xf32>
    %86 = tpu.matmul %83, %85, %cst_79 {dimension_numbers = #tpu.dot_dimension_numbers<[1], [0], [0], [1], [0, 0, 1, 1], [], []>} : vector<32x128xbf16>, vector<128x128xbf16>, vector<32x128xf32> -> vector<32x128xf32>
    %87 = arith.addf %79, %86 : vector<32x128xf32>
    %c0_80 = arith.constant 0 : index
    %c0_81 = arith.constant 0 : index
    %88 = vector.load %arg7[%c0_80, %c0_81] : memref<1x128xf32, #tpu.memory_space<vmem>>, vector<1x128xf32>
    %89 = vector.broadcast %88 : vector<1x128xf32> to vector<32x128xf32>
    %90 = arith.addf %87, %89 : vector<32x128xf32>
    %cst_82 = arith.constant 0.000000e+00 : f32
    %91 = vector.broadcast %cst_82 : f32 to vector<32x128xf32>
    %92 = arith.cmpf ogt, %90, %91 : vector<32x128xf32>
    %cst_83 = arith.constant 0.00999999977 : f32
    %93 = vector.broadcast %cst_83 : f32 to vector<32x128xf32>
    %94 = arith.mulf %93, %90 : vector<32x128xf32>
    %95 = arith.select %92, %90, %94 : vector<32x128xi1>, vector<32x128xf32>
    %96 = arith.truncf %95 : vector<32x128xf32> to vector<32x128xbf16>
    %c0_84 = arith.constant 0 : index
    %c0_85 = arith.constant 0 : index
    %c0_86 = arith.constant 0 : index
    %97 = vector.load %arg8[%c0_84, %c0_85, %c0_86] : memref<5x16x32xbf16, #tpu.memory_space<vmem>>, vector<1x16x32xbf16>
    %98 = vector.shape_cast %97 : vector<1x16x32xbf16> to vector<16x32xbf16>
    %cst_87 = arith.constant dense<0.000000e+00> : vector<16x128xf32>
    %99 = tpu.matmul %98, %96, %cst_87 {dimension_numbers = #tpu.dot_dimension_numbers<[1], [0], [0], [1], [0, 0, 1, 1], [], []>} : vector<16x32xbf16>, vector<32x128xbf16>, vector<16x128xf32> -> vector<16x128xf32>
    %100 = arith.truncf %99 : vector<16x128xf32> to vector<16x128xbf16>
    %c0_88 = arith.constant 0 : index
    %c0_89 = arith.constant 0 : index
    %c0_90 = arith.constant 0 : index
    %101 = vector.load %arg9[%c0_88, %c0_89, %c0_90] : memref<5x128x128xbf16, #tpu.memory_space<vmem>>, vector<1x128x128xbf16>
    %102 = vector.shape_cast %101 : vector<1x128x128xbf16> to vector<128x128xbf16>
    %cst_91 = arith.constant dense<0.000000e+00> : vector<16x128xf32>
    %103 = tpu.matmul %100, %102, %cst_91 {dimension_numbers = #tpu.dot_dimension_numbers<[1], [0], [0], [1], [0, 0, 1, 1], [], []>} : vector<16x128xbf16>, vector<128x128xbf16>, vector<16x128xf32> -> vector<16x128xf32>
    %c1_92 = arith.constant 1 : index
    %c0_93 = arith.constant 0 : index
    %c0_94 = arith.constant 0 : index
    %104 = vector.load %arg8[%c1_92, %c0_93, %c0_94] : memref<5x16x32xbf16, #tpu.memory_space<vmem>>, vector<1x16x32xbf16>
    %105 = vector.shape_cast %104 : vector<1x16x32xbf16> to vector<16x32xbf16>
    %cst_95 = arith.constant dense<0.000000e+00> : vector<16x128xf32>
    %106 = tpu.matmul %105, %96, %cst_95 {dimension_numbers = #tpu.dot_dimension_numbers<[1], [0], [0], [1], [0, 0, 1, 1], [], []>} : vector<16x32xbf16>, vector<32x128xbf16>, vector<16x128xf32> -> vector<16x128xf32>
    %107 = arith.truncf %106 : vector<16x128xf32> to vector<16x128xbf16>
    %c1_96 = arith.constant 1 : index
    %c0_97 = arith.constant 0 : index
    %c0_98 = arith.constant 0 : index
    %108 = vector.load %arg9[%c1_96, %c0_97, %c0_98] : memref<5x128x128xbf16, #tpu.memory_space<vmem>>, vector<1x128x128xbf16>
    %109 = vector.shape_cast %108 : vector<1x128x128xbf16> to vector<128x128xbf16>
    %cst_99 = arith.constant dense<0.000000e+00> : vector<16x128xf32>
    %110 = tpu.matmul %107, %109, %cst_99 {dimension_numbers = #tpu.dot_dimension_numbers<[1], [0], [0], [1], [0, 0, 1, 1], [], []>} : vector<16x128xbf16>, vector<128x128xbf16>, vector<16x128xf32> -> vector<16x128xf32>
    %111 = arith.addf %103, %110 : vector<16x128xf32>
    %c2_100 = arith.constant 2 : index
    %c0_101 = arith.constant 0 : index
    %c0_102 = arith.constant 0 : index
    %112 = vector.load %arg8[%c2_100, %c0_101, %c0_102] : memref<5x16x32xbf16, #tpu.memory_space<vmem>>, vector<1x16x32xbf16>
    %113 = vector.shape_cast %112 : vector<1x16x32xbf16> to vector<16x32xbf16>
    %cst_103 = arith.constant dense<0.000000e+00> : vector<16x128xf32>
    %114 = tpu.matmul %113, %96, %cst_103 {dimension_numbers = #tpu.dot_dimension_numbers<[1], [0], [0], [1], [0, 0, 1, 1], [], []>} : vector<16x32xbf16>, vector<32x128xbf16>, vector<16x128xf32> -> vector<16x128xf32>
    %115 = arith.truncf %114 : vector<16x128xf32> to vector<16x128xbf16>
    %c2_104 = arith.constant 2 : index
    %c0_105 = arith.constant 0 : index
    %c0_106 = arith.constant 0 : index
    %116 = vector.load %arg9[%c2_104, %c0_105, %c0_106] : memref<5x128x128xbf16, #tpu.memory_space<vmem>>, vector<1x128x128xbf16>
    %117 = vector.shape_cast %116 : vector<1x128x128xbf16> to vector<128x128xbf16>
    %cst_107 = arith.constant dense<0.000000e+00> : vector<16x128xf32>
    %118 = tpu.matmul %115, %117, %cst_107 {dimension_numbers = #tpu.dot_dimension_numbers<[1], [0], [0], [1], [0, 0, 1, 1], [], []>} : vector<16x128xbf16>, vector<128x128xbf16>, vector<16x128xf32> -> vector<16x128xf32>
    %119 = arith.addf %111, %118 : vector<16x128xf32>
    %c3_108 = arith.constant 3 : index
    %c0_109 = arith.constant 0 : index
    %c0_110 = arith.constant 0 : index
    %120 = vector.load %arg8[%c3_108, %c0_109, %c0_110] : memref<5x16x32xbf16, #tpu.memory_space<vmem>>, vector<1x16x32xbf16>
    %121 = vector.shape_cast %120 : vector<1x16x32xbf16> to vector<16x32xbf16>
    %cst_111 = arith.constant dense<0.000000e+00> : vector<16x128xf32>
    %122 = tpu.matmul %121, %96, %cst_111 {dimension_numbers = #tpu.dot_dimension_numbers<[1], [0], [0], [1], [0, 0, 1, 1], [], []>} : vector<16x32xbf16>, vector<32x128xbf16>, vector<16x128xf32> -> vector<16x128xf32>
    %123 = arith.truncf %122 : vector<16x128xf32> to vector<16x128xbf16>
    %c3_112 = arith.constant 3 : index
    %c0_113 = arith.constant 0 : index
    %c0_114 = arith.constant 0 : index
    %124 = vector.load %arg9[%c3_112, %c0_113, %c0_114] : memref<5x128x128xbf16, #tpu.memory_space<vmem>>, vector<1x128x128xbf16>
    %125 = vector.shape_cast %124 : vector<1x128x128xbf16> to vector<128x128xbf16>
    %cst_115 = arith.constant dense<0.000000e+00> : vector<16x128xf32>
    %126 = tpu.matmul %123, %125, %cst_115 {dimension_numbers = #tpu.dot_dimension_numbers<[1], [0], [0], [1], [0, 0, 1, 1], [], []>} : vector<16x128xbf16>, vector<128x128xbf16>, vector<16x128xf32> -> vector<16x128xf32>
    %127 = arith.addf %119, %126 : vector<16x128xf32>
    %c4_116 = arith.constant 4 : index
    %c0_117 = arith.constant 0 : index
    %c0_118 = arith.constant 0 : index
    %128 = vector.load %arg8[%c4_116, %c0_117, %c0_118] : memref<5x16x32xbf16, #tpu.memory_space<vmem>>, vector<1x16x32xbf16>
    %129 = vector.shape_cast %128 : vector<1x16x32xbf16> to vector<16x32xbf16>
    %cst_119 = arith.constant dense<0.000000e+00> : vector<16x128xf32>
    %130 = tpu.matmul %129, %96, %cst_119 {dimension_numbers = #tpu.dot_dimension_numbers<[1], [0], [0], [1], [0, 0, 1, 1], [], []>} : vector<16x32xbf16>, vector<32x128xbf16>, vector<16x128xf32> -> vector<16x128xf32>
    %131 = arith.truncf %130 : vector<16x128xf32> to vector<16x128xbf16>
    %c4_120 = arith.constant 4 : index
    %c0_121 = arith.constant 0 : index
    %c0_122 = arith.constant 0 : index
    %132 = vector.load %arg9[%c4_120, %c0_121, %c0_122] : memref<5x128x128xbf16, #tpu.memory_space<vmem>>, vector<1x128x128xbf16>
    %133 = vector.shape_cast %132 : vector<1x128x128xbf16> to vector<128x128xbf16>
    %cst_123 = arith.constant dense<0.000000e+00> : vector<16x128xf32>
    %134 = tpu.matmul %131, %133, %cst_123 {dimension_numbers = #tpu.dot_dimension_numbers<[1], [0], [0], [1], [0, 0, 1, 1], [], []>} : vector<16x128xbf16>, vector<128x128xbf16>, vector<16x128xf32> -> vector<16x128xf32>
    %135 = arith.addf %127, %134 : vector<16x128xf32>
    %c0_124 = arith.constant 0 : index
    %c0_125 = arith.constant 0 : index
    %136 = vector.load %arg10[%c0_124, %c0_125] : memref<1x128xf32, #tpu.memory_space<vmem>>, vector<1x128xf32>
    %137 = vector.broadcast %136 : vector<1x128xf32> to vector<16x128xf32>
    %138 = arith.addf %135, %137 : vector<16x128xf32>
    %cst_126 = arith.constant 0.000000e+00 : f32
    %139 = vector.broadcast %cst_126 : f32 to vector<16x128xf32>
    %140 = arith.cmpf ogt, %138, %139 : vector<16x128xf32>
    %cst_127 = arith.constant 0.00999999977 : f32
    %141 = vector.broadcast %cst_127 : f32 to vector<16x128xf32>
    %142 = arith.mulf %141, %138 : vector<16x128xf32>
    %143 = arith.select %140, %138, %142 : vector<16x128xi1>, vector<16x128xf32>
    %144 = arith.truncf %143 : vector<16x128xf32> to vector<16x128xbf16>
    %c0_128 = arith.constant 0 : index
    %c0_129 = arith.constant 0 : index
    %145 = vector.load %arg1[%c0_128, %c0_129] : memref<4x16xbf16, #tpu.memory_space<vmem>>, vector<4x16xbf16>
    %c0_130 = arith.constant 0 : index
    %c0_131 = arith.constant 0 : index
    %146 = vector.load %arg13[%c0_130, %c0_131] : memref<16x128xbf16, #tpu.memory_space<vmem>>, vector<16x128xbf16>
    %cst_132 = arith.constant dense<0.000000e+00> : vector<4x128xf32>
    %147 = tpu.matmul %145, %146, %cst_132 {dimension_numbers = #tpu.dot_dimension_numbers<[1], [0], [0], [1], [0, 0, 1, 1], [], []>} : vector<4x16xbf16>, vector<16x128xbf16>, vector<4x128xf32> -> vector<4x128xf32>
    %c0_133 = arith.constant 0 : index
    %c0_134 = arith.constant 0 : index
    %c0_135 = arith.constant 0 : index
    %148 = vector.load %arg11[%c0_133, %c0_134, %c0_135] : memref<4x4x16xbf16, #tpu.memory_space<vmem>>, vector<1x4x16xbf16>
    %149 = vector.shape_cast %148 : vector<1x4x16xbf16> to vector<4x16xbf16>
    %cst_136 = arith.constant dense<0.000000e+00> : vector<4x128xf32>
    %150 = tpu.matmul %149, %144, %cst_136 {dimension_numbers = #tpu.dot_dimension_numbers<[1], [0], [0], [1], [0, 0, 1, 1], [], []>} : vector<4x16xbf16>, vector<16x128xbf16>, vector<4x128xf32> -> vector<4x128xf32>
    %151 = arith.truncf %150 : vector<4x128xf32> to vector<4x128xbf16>
    %c0_137 = arith.constant 0 : index
    %c0_138 = arith.constant 0 : index
    %c0_139 = arith.constant 0 : index
    %152 = vector.load %arg12[%c0_137, %c0_138, %c0_139] : memref<4x128x128xbf16, #tpu.memory_space<vmem>>, vector<1x128x128xbf16>
    %153 = vector.shape_cast %152 : vector<1x128x128xbf16> to vector<128x128xbf16>
    %cst_140 = arith.constant dense<0.000000e+00> : vector<4x128xf32>
    %154 = tpu.matmul %151, %153, %cst_140 {dimension_numbers = #tpu.dot_dimension_numbers<[1], [0], [0], [1], [0, 0, 1, 1], [], []>} : vector<4x128xbf16>, vector<128x128xbf16>, vector<4x128xf32> -> vector<4x128xf32>
    %155 = arith.addf %147, %154 : vector<4x128xf32>
    %c1_141 = arith.constant 1 : index
    %c0_142 = arith.constant 0 : index
    %c0_143 = arith.constant 0 : index
    %156 = vector.load %arg11[%c1_141, %c0_142, %c0_143] : memref<4x4x16xbf16, #tpu.memory_space<vmem>>, vector<1x4x16xbf16>
    %157 = vector.shape_cast %156 : vector<1x4x16xbf16> to vector<4x16xbf16>
    %cst_144 = arith.constant dense<0.000000e+00> : vector<4x128xf32>
    %158 = tpu.matmul %157, %144, %cst_144 {dimension_numbers = #tpu.dot_dimension_numbers<[1], [0], [0], [1], [0, 0, 1, 1], [], []>} : vector<4x16xbf16>, vector<16x128xbf16>, vector<4x128xf32> -> vector<4x128xf32>
    %159 = arith.truncf %158 : vector<4x128xf32> to vector<4x128xbf16>
    %c1_145 = arith.constant 1 : index
    %c0_146 = arith.constant 0 : index
    %c0_147 = arith.constant 0 : index
    %160 = vector.load %arg12[%c1_145, %c0_146, %c0_147] : memref<4x128x128xbf16, #tpu.memory_space<vmem>>, vector<1x128x128xbf16>
    %161 = vector.shape_cast %160 : vector<1x128x128xbf16> to vector<128x128xbf16>
    %cst_148 = arith.constant dense<0.000000e+00> : vector<4x128xf32>
    %162 = tpu.matmul %159, %161, %cst_148 {dimension_numbers = #tpu.dot_dimension_numbers<[1], [0], [0], [1], [0, 0, 1, 1], [], []>} : vector<4x128xbf16>, vector<128x128xbf16>, vector<4x128xf32> -> vector<4x128xf32>
    %163 = arith.addf %155, %162 : vector<4x128xf32>
    %c2_149 = arith.constant 2 : index
    %c0_150 = arith.constant 0 : index
    %c0_151 = arith.constant 0 : index
    %164 = vector.load %arg11[%c2_149, %c0_150, %c0_151] : memref<4x4x16xbf16, #tpu.memory_space<vmem>>, vector<1x4x16xbf16>
    %165 = vector.shape_cast %164 : vector<1x4x16xbf16> to vector<4x16xbf16>
    %cst_152 = arith.constant dense<0.000000e+00> : vector<4x128xf32>
    %166 = tpu.matmul %165, %144, %cst_152 {dimension_numbers = #tpu.dot_dimension_numbers<[1], [0], [0], [1], [0, 0, 1, 1], [], []>} : vector<4x16xbf16>, vector<16x128xbf16>, vector<4x128xf32> -> vector<4x128xf32>
    %167 = arith.truncf %166 : vector<4x128xf32> to vector<4x128xbf16>
    %c2_153 = arith.constant 2 : index
    %c0_154 = arith.constant 0 : index
    %c0_155 = arith.constant 0 : index
    %168 = vector.load %arg12[%c2_153, %c0_154, %c0_155] : memref<4x128x128xbf16, #tpu.memory_space<vmem>>, vector<1x128x128xbf16>
    %169 = vector.shape_cast %168 : vector<1x128x128xbf16> to vector<128x128xbf16>
    %cst_156 = arith.constant dense<0.000000e+00> : vector<4x128xf32>
    %170 = tpu.matmul %167, %169, %cst_156 {dimension_numbers = #tpu.dot_dimension_numbers<[1], [0], [0], [1], [0, 0, 1, 1], [], []>} : vector<4x128xbf16>, vector<128x128xbf16>, vector<4x128xf32> -> vector<4x128xf32>
    %171 = arith.addf %163, %170 : vector<4x128xf32>
    %c3_157 = arith.constant 3 : index
    %c0_158 = arith.constant 0 : index
    %c0_159 = arith.constant 0 : index
    %172 = vector.load %arg11[%c3_157, %c0_158, %c0_159] : memref<4x4x16xbf16, #tpu.memory_space<vmem>>, vector<1x4x16xbf16>
    %173 = vector.shape_cast %172 : vector<1x4x16xbf16> to vector<4x16xbf16>
    %cst_160 = arith.constant dense<0.000000e+00> : vector<4x128xf32>
    %174 = tpu.matmul %173, %144, %cst_160 {dimension_numbers = #tpu.dot_dimension_numbers<[1], [0], [0], [1], [0, 0, 1, 1], [], []>} : vector<4x16xbf16>, vector<16x128xbf16>, vector<4x128xf32> -> vector<4x128xf32>
    %175 = arith.truncf %174 : vector<4x128xf32> to vector<4x128xbf16>
    %c3_161 = arith.constant 3 : index
    %c0_162 = arith.constant 0 : index
    %c0_163 = arith.constant 0 : index
    %176 = vector.load %arg12[%c3_161, %c0_162, %c0_163] : memref<4x128x128xbf16, #tpu.memory_space<vmem>>, vector<1x128x128xbf16>
    %177 = vector.shape_cast %176 : vector<1x128x128xbf16> to vector<128x128xbf16>
    %cst_164 = arith.constant dense<0.000000e+00> : vector<4x128xf32>
    %178 = tpu.matmul %175, %177, %cst_164 {dimension_numbers = #tpu.dot_dimension_numbers<[1], [0], [0], [1], [0, 0, 1, 1], [], []>} : vector<4x128xbf16>, vector<128x128xbf16>, vector<4x128xf32> -> vector<4x128xf32>
    %179 = arith.addf %171, %178 : vector<4x128xf32>
    %c0_165 = arith.constant 0 : index
    %c0_166 = arith.constant 0 : index
    %180 = vector.load %arg14[%c0_165, %c0_166] : memref<1x128xf32, #tpu.memory_space<vmem>>, vector<1x128xf32>
    %181 = vector.broadcast %180 : vector<1x128xf32> to vector<4x128xf32>
    %182 = arith.addf %179, %181 : vector<4x128xf32>
    %cst_167 = arith.constant 0.000000e+00 : f32
    %183 = vector.broadcast %cst_167 : f32 to vector<4x128xf32>
    %184 = arith.cmpf ogt, %182, %183 : vector<4x128xf32>
    %cst_168 = arith.constant 0.00999999977 : f32
    %185 = vector.broadcast %cst_168 : f32 to vector<4x128xf32>
    %186 = arith.mulf %185, %182 : vector<4x128xf32>
    %187 = arith.select %184, %182, %186 : vector<4x128xi1>, vector<4x128xf32>
    %c0_169 = arith.constant 0 : index
    %c0_170 = arith.constant 0 : index
    %188 = vector.load %arg15[%c0_169, %c0_170] : memref<1x128xbf16, #tpu.memory_space<vmem>>, vector<1x128xbf16>
    %189 = arith.extf %188 : vector<1x128xbf16> to vector<1x128xf32>
    %190 = vector.broadcast %189 : vector<1x128xf32> to vector<4x128xf32>
    %191 = arith.mulf %187, %190 : vector<4x128xf32>
    %cst_171 = arith.constant dense<0.000000e+00> : vector<4xf32>
    %192 = vector.multi_reduction <add>, %191, %cst_171 [1] : vector<4x128xf32> to vector<4xf32>
    %193 = vector.shape_cast %192 : vector<4xf32> to vector<4x1xf32>
    %c0_172 = arith.constant 0 : index
    %194 = memref.load %arg16[%c0_172] : memref<1xf32, #tpu.memory_space<smem>>
    %195 = vector.broadcast %194 : f32 to vector<4x1xf32>
    %196 = arith.addf %193, %195 : vector<4x1xf32>
    %c0_173 = arith.constant 0 : index
    %c0_174 = arith.constant 0 : index
    %197 = vector.load %arg17[%c0_173, %c0_174] : memref<4x1xf32, #tpu.memory_space<vmem>>, vector<4x1xf32>
    tpu.vector_store %arg17[%c0_173, %c0_174], %196 {strides = array<i32>} : memref<4x1xf32, #tpu.memory_space<vmem>>, vector<4x1xf32>,
    return
  }
}

</mosaic_0001>

<bundles_post_ra>
// kernel: tile.18
= control target key start
LH: loop header
LB: loop body
LE: loop exit
PB: predicated region body
PF: predicated region fallthrough
CT: control target
= control target key end

     0   :  { %s28_s0 = inlined_call_operand.vmem [shape: f32[8], index: 0, kind: input, shape index: {}]   ;;  %s29_s1 = inlined_call_operand.vmem [shape: f32[16,8], index: 1, kind: output, shape index: {}]  }
   0x1   :  { %v4_v0 = vld [vmem:[%s28_s0] ss:$0 sm:$0xff] }
   0x2   :  { %5 = vst [vmem:[%s29_s1] sm:$0xff] %v4_v0  ;;  %8 = vst [vmem:[%s29_s1 + $0x8] sm:$0xff] %v4_v0 }

// kernel: tile.19
= control target key start
LH: loop header
LB: loop body
LE: loop exit
PB: predicated region body
PF: predicated region fallthrough
CT: control target
= control target key end

     0   :  { %s131_s10 = smov 120   ;;  %s132_s11 = smov 104   ;;  %vm3_vm0 = vcmask 64512   ;;  %vm9_vm1 = vcmask 1048512   ;;  %vm15_vm2 = vcmask 982912   ;;  %vm21_vm3 = vcmask 917312   ;;  %s207_s0 = inlined_call_operand.vmem [shape: f32[16,8], index: 0, kind: input, shape index: {}]   ;;  %s208_s1 = inlined_call_operand.vmem [shape: f32[1,128], index: 1, kind: output, shape index: {}]  }
   0x1   :  { %v101_v0 = vld [vmem:[%s207_s0 + $0xf] sm:$0x1]   ;;  %v103_v1 = vld [vmem:[%s207_s0 + $0xd] sm:$0x1]   ;;  %v102_v2 = vld [vmem:[%s207_s0 + $0xe] sm:$0x1]  }
   0x2   :  { %7 = vrot.lane.b32.xlu0 %v101_v0, %s131_s10  ;;  %19 = vrot.lane.b32.xlu1 %v103_v1, %s132_s11  ;;  %v104_v3 = vld [vmem:[%s207_s0 + $0xc] sm:$0x1]   ;;  %s133_s16 = smov 112   ;;  %s134_s17 = smov 96   ;;  %v105_v4 = vld [vmem:[%s207_s0 + $0xb] sm:$0x1]  }
   0x3   :  { %v106_v5 = vld [vmem:[%s207_s0 + $0xa] sm:$0x1]   ;;  %v2_v6 = vld [vmem:[%s207_s0] sm:$0x1]   ;;  %s135_s24 = smov 88   ;;  %s136_s25 = smov 80  }
   0x4   :  { %4 = vst.msk [vmem:[#allocation0] sm:$0x1] %vm3_vm0, %v2_v6   ;;  %v107_v7 = vld [vmem:[%s207_s0 + $0x9] sm:$0x1]   ;;  %v108_v8 = vld [vmem:[%s207_s0 + $0x8] sm:$0x1]  }
   0x5   :  { %s137_s30 = smov 72   ;;  %s138_s2 = smov 64   ;;  %v109_v9 = vld [vmem:[%s207_s0 + $0x7] sm:$0x1]   ;;  %v110_v10 = vld [vmem:[%s207_s0 + $0x6] sm:$0x1]  }
   0x6   :  { %13 = vrot.lane.b32.xlu0 %v102_v2, %s133_s16  ;;  %25 = vrot.lane.b32.xlu1 %v104_v3, %s134_s17  ;;  %s139_s7 = smov 56   ;;  %s140_s8 = smov 48   ;;  %v111_v11 = vld [vmem:[%s207_s0 + $0x5] sm:$0x1]   ;;  %v112_v12 = vld [vmem:[%s207_s0 + $0x4] sm:$0x1]  }
   0x7   :  { %s141_s13 = smov 40   ;;  %s142_s14 = smov 32   ;;  %v113_v13 = vld [vmem:[%s207_s0 + $0x3] sm:$0x1]   ;;  %v114_v14 = vld [vmem:[%s207_s0 + $0x2] sm:$0x1]  }
   0x8   :  { %s143_s19 = smov 24   ;;  %s144_s20 = smov 16   ;;  %v115_v15 = vld [vmem:[%s207_s0 + $0x1] sm:$0x1]   ;;  %vm27_vm4 = vcmask 851712   ;;  %vm33_vm5 = vcmask 786112  }
   0x9   :  { %s145_s0 = smov 8   ;;  %vm39_vm6 = vcmask 720512   ;;  %vm45_vm7 = vcmask 654912   ;;  %vm51_vm8 = vcmask 589312   ;;  %vm57_vm9 = vcmask 523712  }
   0xa   :  { %31 = vrot.lane.b32.xlu0 %v105_v4, %s135_s24  ;;  %37 = vrot.lane.b32.xlu1 %v106_v5, %s136_s25  ;;  %vm63_vm10 = vcmask 458112   ;;  %vm69_vm11 = vcmask 392512   ;;  %vm75_vm12 = vcmask 326912   ;;  %vm81_vm13 = vcmask 261312  }
   0xb   :  { %vm87_vm14 = vcmask 195712   ;;  %vm93_vm15 = vcmask 130112  }
   0xe   :  { %43 = vrot.lane.b32.xlu0 %v107_v7, %s137_s30  ;;  %49 = vrot.lane.b32.xlu1 %v108_v8, %s138_s2 }
  0x12   :  { %55 = vrot.lane.b32.xlu0 %v109_v9, %s139_s7  ;;  %61 = vrot.lane.b32.xlu1 %v110_v10, %s140_s8 }
  0x16   :  { %67 = vrot.lane.b32.xlu0 %v111_v11, %s141_s13  ;;  %73 = vrot.lane.b32.xlu1 %v112_v12, %s142_s14 }
  0x1a   :  { %79 = vrot.lane.b32.xlu0 %v113_v13, %s143_s19  ;;  %85 = vrot.lane.b32.xlu1 %v114_v14, %s144_s20 }
  0x1e   :  { %91 = vrot.lane.b32.xlu0 %v115_v15, %s145_s0 }
  0x74   :  { %v8_v16 = vpop.permute.xlu0 %7   ;;  %v20_v17 = vpop.permute.xlu1 %19  }
  0x75   :  { %10 = vst.msk [vmem:[#allocation0] sm:$0x1] %vm9_vm1, %v8_v16  }
  0x78   :  { %v14_v18 = vpop.permute.xlu0 %13   ;;  %v26_v19 = vpop.permute.xlu1 %25  }
  0x79   :  { %16 = vst.msk [vmem:[#allocation0] sm:$0x1] %vm15_vm2, %v14_v18  }
  0x7a   :  { %22 = vst.msk [vmem:[#allocation0] sm:$0x1] %vm21_vm3, %v20_v17  }
  0x7b   :  { %28 = vst.msk [vmem:[#allocation0] sm:$0x1] %vm27_vm4, %v26_v19  }
  0x7c   :  { %v32_v20 = vpop.permute.xlu0 %31   ;;  %v38_v21 = vpop.permute.xlu1 %37  }
  0x7d   :  { %34 = vst.msk [vmem:[#allocation0] sm:$0x1] %vm33_vm5, %v32_v20  }
  0x7e   :  { %40 = vst.msk [vmem:[#allocation0] sm:$0x1] %vm39_vm6, %v38_v21  }
  0x80   :  { %v44_v22 = vpop.permute.xlu0 %43   ;;  %v50_v23 = vpop.permute.xlu1 %49  }
  0x81   :  { %46 = vst.msk [vmem:[#allocation0] sm:$0x1] %vm45_vm7, %v44_v22  }
  0x82   :  { %52 = vst.msk [vmem:[#allocation0] sm:$0x1] %vm51_vm8, %v50_v23  }
  0x84   :  { %v56_v24 = vpop.permute.xlu0 %55   ;;  %v62_v25 = vpop.permute.xlu1 %61  }
  0x85   :  { %58 = vst.msk [vmem:[#allocation0] sm:$0x1] %vm57_vm9, %v56_v24  }
  0x86   :  { %64 = vst.msk [vmem:[#allocation0] sm:$0x1] %vm63_vm10, %v62_v25  }
  0x88   :  { %v68_v26 = vpop.permute.xlu0 %67   ;;  %v74_v27 = vpop.permute.xlu1 %73  }
  0x89   :  { %70 = vst.msk [vmem:[#allocation0] sm:$0x1] %vm69_vm11, %v68_v26  }
  0x8a   :  { %76 = vst.msk [vmem:[#allocation0] sm:$0x1] %vm75_vm12, %v74_v27  }
  0x8c   :  { %v80_v28 = vpop.permute.xlu0 %79   ;;  %v86_v29 = vpop.permute.xlu1 %85  }
  0x8d   :  { %82 = vst.msk [vmem:[#allocation0] sm:$0x1] %vm81_vm13, %v80_v28  }
  0x8e   :  { %88 = vst.msk [vmem:[#allocation0] sm:$0x1] %vm87_vm14, %v86_v29  }
  0x90   :  { %v92_v30 = vpop.permute.xlu0 %91  }
  0x91   :  { %94 = vst.msk [vmem:[#allocation0] sm:$0x1] %vm93_vm15, %v92_v30  }
  0x98   :  { %v98_v31 = vld [vmem:[#allocation0] sm:$0x1] }
  0x99   :  { %100 = vst [vmem:[%s208_s1] sm:$0x1] %v98_v31 }

// kernel: tile.23
= control target key start
LH: loop header
LB: loop body
LE: loop exit
PB: predicated region body
PF: predicated region fallthrough
CT: control target
= control target key end

     0   :  { %s22_s0 = inlined_call_operand.vmem [shape: f32[16], index: 0, kind: input, shape index: {}]   ;;  %s23_s1 = inlined_call_operand.vmem [shape: f32[8,16], index: 1, kind: output, shape index: {}]  }
   0x1   :  { %v4_v0 = vld [vmem:[%s22_s0] ss:$0 sm:$0xff] }
   0x2   :  { %5 = vst [vmem:[%s23_s1] sm:$0xff] %v4_v0 }

// kernel: tile.24
= control target key start
LH: loop header
LB: loop body
LE: loop exit
PB: predicated region body
PF: predicated region fallthrough
CT: control target
= control target key end

     0   :  { %s67_s10 = smov 112   ;;  %s68_s11 = smov 80   ;;  %vm3_vm0 = vcmask 130048   ;;  %vm9_vm1 = vcmask 1048448   ;;  %vm15_vm2 = vcmask 917248   ;;  %vm21_vm3 = vcmask 786048   ;;  %s111_s0 = inlined_call_operand.vmem [shape: f32[8,16], index: 0, kind: input, shape index: {}]   ;;  %s112_s1 = inlined_call_operand.vmem [shape: f32[1,128], index: 1, kind: output, shape index: {}]  }
   0x1   :  { %v53_v0 = vld [vmem:[%s111_s0 + $0x7] sm:$0x1]   ;;  %v55_v1 = vld [vmem:[%s111_s0 + $0x5] sm:$0x1]   ;;  %v54_v2 = vld [vmem:[%s111_s0 + $0x6] sm:$0x1]  }
   0x2   :  { %7 = vrot.lane.b32.xlu0 %v53_v0, %s67_s10  ;;  %19 = vrot.lane.b32.xlu1 %v55_v1, %s68_s11  ;;  %v56_v3 = vld [vmem:[%s111_s0 + $0x4] sm:$0x1]   ;;  %v2_v4 = vld [vmem:[%s111_s0] sm:$0x1]   ;;  %s69_s18 = smov 96   ;;  %s70_s19 = smov 64  }
   0x3   :  { %4 = vst.msk [vmem:[#allocation0] sm:$0x1] %vm3_vm0, %v2_v4   ;;  %v57_v5 = vld [vmem:[%s111_s0 + $0x3] sm:$0x1]   ;;  %v58_v6 = vld [vmem:[%s111_s0 + $0x2] sm:$0x1]  }
   0x4   :  { %s71_s24 = smov 48   ;;  %s72_s25 = smov 32   ;;  %v59_v7 = vld [vmem:[%s111_s0 + $0x1] sm:$0x1]   ;;  %vm27_vm4 = vcmask 654848   ;;  %vm33_vm5 = vcmask 523648  }
   0x5   :  { %s73_s0 = smov 16   ;;  %vm39_vm6 = vcmask 392448   ;;  %vm45_vm7 = vcmask 261248  }
   0x6   :  { %13 = vrot.lane.b32.xlu0 %v54_v2, %s69_s18  ;;  %25 = vrot.lane.b32.xlu1 %v56_v3, %s70_s19 }
   0xa   :  { %31 = vrot.lane.b32.xlu0 %v57_v5, %s71_s24  ;;  %37 = vrot.lane.b32.xlu1 %v58_v6, %s72_s25 }
   0xe   :  { %43 = vrot.lane.b32.xlu0 %v59_v7, %s73_s0 }
  0x74   :  { %v8_v8 = vpop.permute.xlu0 %7   ;;  %v20_v9 = vpop.permute.xlu1 %19  }
  0x75   :  { %10 = vst.msk [vmem:[#allocation0] sm:$0x1] %vm9_vm1, %v8_v8  }
  0x78   :  { %v14_v10 = vpop.permute.xlu0 %13   ;;  %v26_v11 = vpop.permute.xlu1 %25  }
  0x79   :  { %16 = vst.msk [vmem:[#allocation0] sm:$0x1] %vm15_vm2, %v14_v10  }
  0x7a   :  { %22 = vst.msk [vmem:[#allocation0] sm:$0x1] %vm21_vm3, %v20_v9  }
  0x7b   :  { %28 = vst.msk [vmem:[#allocation0] sm:$0x1] %vm27_vm4, %v26_v11  }
  0x7c   :  { %v32_v12 = vpop.permute.xlu0 %31   ;;  %v38_v13 = vpop.permute.xlu1 %37  }
  0x7d   :  { %34 = vst.msk [vmem:[#allocation0] sm:$0x1] %vm33_vm5, %v32_v12  }
  0x7e   :  { %40 = vst.msk [vmem:[#allocation0] sm:$0x1] %vm39_vm6, %v38_v13  }
  0x80   :  { %v44_v14 = vpop.permute.xlu0 %43  }
  0x81   :  { %46 = vst.msk [vmem:[#allocation0] sm:$0x1] %vm45_vm7, %v44_v14  }
  0x88   :  { %v50_v15 = vld [vmem:[#allocation0] sm:$0x1] }
  0x89   :  { %52 = vst [vmem:[%s112_s1] sm:$0x1] %v50_v15 }

// kernel: tile.28
= control target key start
LH: loop header
LB: loop body
LE: loop exit
PB: predicated region body
PF: predicated region fallthrough
CT: control target
= control target key end

     0   :  { %s22_s0 = inlined_call_operand.vmem [shape: f32[32], index: 0, kind: input, shape index: {}]   ;;  %s23_s1 = inlined_call_operand.vmem [shape: f32[4,32], index: 1, kind: output, shape index: {}]  }
   0x1   :  { %v4_v0 = vld [vmem:[%s22_s0] ss:$0 sm:$0xff] }
   0x2   :  { %5 = vst [vmem:[%s23_s1] sm:$0xf] %v4_v0 }

// kernel: tile.29
= control target key start
LH: loop header
LB: loop body
LE: loop exit
PB: predicated region body
PF: predicated region fallthrough
CT: control target
= control target key end

     0   :  { %vm7_vm0 = vcmask 261120   ;;  %s37_s8 = smov 32   ;;  %s38_s9 = smov 64   ;;  %vm13_vm1 = vcmask 1048320   ;;  %vm19_vm2 = vcmask 785920   ;;  %vm25_vm3 = vcmask 523520   ;;  %s55_s0 = inlined_call_operand.vmem [shape: f32[4,32], index: 0, kind: input, shape index: {}]   ;;  %s56_s1 = inlined_call_operand.vmem [shape: f32[1,128], index: 1, kind: output, shape index: {}]  }
   0x1   :  { %v4_v0 = vld [vmem:[%s55_s0] sm:$0xf]  ;;  %s36_s0 = smov 96  }
   0x2   :  { %5 = vst [vmem:[#allocation1] sm:$0xf] %v4_v0 }
   0x9   :  { %v10_v1 = vld [vmem:[#allocation1 + $0x3] sm:$0x1]   ;;  %v22_v2 = vld [vmem:[#allocation1 + $0x1] sm:$0x1]   ;;  %v6_v3 = vld [vmem:[#allocation1] sm:$0x1]  }
   0xa   :  { %11 = vrot.lane.b32.xlu0 %v10_v1, %s36_s0  ;;  %23 = vrot.lane.b32.xlu1 %v22_v2, %s37_s8  ;;  %v16_v4 = vld [vmem:[#allocation1 + $0x2] sm:$0x1]   ;;  %8 = vst.msk [vmem:[#allocation0] sm:$0x1] %vm7_vm0, %v6_v3  }
   0xe   :  { %17 = vrot.lane.b32.xlu0 %v16_v4, %s38_s9 }
  0x7c   :  { %v12_v5 = vpop.permute.xlu0 %11   ;;  %v24_v6 = vpop.permute.xlu1 %23  }
  0x7d   :  { %14 = vst.msk [vmem:[#allocation0] sm:$0x1] %vm13_vm1, %v12_v5  }
  0x80   :  { %v18_v7 = vpop.permute.xlu0 %17  }
  0x81   :  { %20 = vst.msk [vmem:[#allocation0] sm:$0x1] %vm19_vm2, %v18_v7  }
  0x82   :  { %26 = vst.msk [vmem:[#allocation0] sm:$0x1] %vm25_vm3, %v24_v6  }
  0x89   :  { %v30_v8 = vld [vmem:[#allocation0] sm:$0x1] }
  0x8a   :  { %32 = vst [vmem:[%s56_s1] sm:$0x1] %v30_v8 }

// kernel: dc_joint_discriminator.1
= control target key start
LH: loop header
LB: loop body
LE: loop exit
PB: predicated region body
PF: predicated region fallthrough
CT: control target
= control target key end

     0   :  { %vm386_vm0 = vcmask 785408   ;;  %vm1342_vm1 = vcmask 523264   ;;  %vm5475_vm10 = vmmov 0   ;;  %vm2301_vm15 = vcmask 261120   ;;  %s6510_s0 = inlined_call_operand.vmem [shape: bf16[128,96], index: 0, kind: input, shape index: {}]   ;;  %s6511_s2 = inlined_call_operand.vmem [shape: bf16[5,64,128], index: 2, kind: input, shape index: {}]   ;;  %s6512_s3 = inlined_call_operand.vmem [shape: bf16[5,96,128], index: 3, kind: input, shape index: {}]   ;;  %s6513_s5 = inlined_call_operand.vmem [shape: bf16[5,32,64], index: 5, kind: input, shape index: {}]   ;;  %s6514_s6 = inlined_call_operand.vmem [shape: bf16[5,128,128], index: 6, kind: input, shape index: {}]   ;;  %s6515_s4 = inlined_call_operand.vmem [shape: f32[1,128], index: 4, kind: input, shape index: {}]   ;;  %s6516_s8 = inlined_call_operand.vmem [shape: bf16[5,16,32], index: 8, kind: input, shape index: {}]   ;;  %s6517_s9 = inlined_call_operand.vmem [shape: bf16[5,128,128], index: 9, kind: input, shape index: {}]   ;;  %s6518_s7 = inlined_call_operand.vmem [shape: f32[1,128], index: 7, kind: input, shape index: {}]   ;;  %s6519_s13 = inlined_call_operand.vmem [shape: bf16[16,128], index: 13, kind: input, shape index: {}]   ;;  %s6520_s1 = inlined_call_operand.vmem [shape: bf16[4,16], index: 1, kind: input, shape index: {}]   ;;  %s6521_s12 = inlined_call_operand.vmem [shape: bf16[4,128,128], index: 12, kind: input, shape index: {}]   ;;  %s6522_s10 = inlined_call_operand.vmem [shape: f32[1,128], index: 10, kind: input, shape index: {}]   ;;  %s6523_s11 = inlined_call_operand.vmem [shape: bf16[4,4,16], index: 11, kind: input, shape index: {}]   ;;  %s6524_s15 = inlined_call_operand.vmem [shape: bf16[1,128], index: 15, kind: input, shape index: {}]   ;;  %s6525_s14 = inlined_call_operand.vmem [shape: f32[1,128], index: 14, kind: input, shape index: {}]   ;;  %s6526_s16 = inlined_call_operand.<no memory space> [shape: f32[1], index: 16, kind: input, shape index: {}]   ;;  %s6527_s17 = inlined_call_operand.vmem [shape: f32[4,1], index: 17, kind: output, shape index: {}]  }
   0x1   :  { %6530 = sst [smem:[#allocation3_spill]] %s6510_s0  ;;  %v5316_v11 = vld [vmem:[%s6512_s3 + $0x30] sm:$0xff]   ;;  %v5317_v15 = vld [vmem:[%s6512_s3 + $0x38] sm:$0xff]   ;;  %v5318_v19 = vld [vmem:[%s6512_s3 + $0x40] sm:$0xff]  }
   0x2   :  { %6531 = sst [smem:[#allocation4_spill]] %s6511_s2  ;;  %s6532_s26 = sld [smem:[#allocation3_spill]]  ;;  %v5319_v20 = vld [vmem:[%s6512_s3 + $0x48] sm:$0xff]   ;;  %v5320_v21 = vld [vmem:[%s6512_s3 + $0x50] sm:$0xff]   ;;  %v5321_v30 = vld [vmem:[%s6512_s3 + $0x58] sm:$0xff]  }
   0x3   :  { %s6533_s20 = sld [smem:[#allocation4_spill]]  ;;  %v5322_v31 = vld [vmem:[%s6512_s3] sm:$0xff]   ;;  %v5323_v47 = vld [vmem:[%s6512_s3 + $0x8] sm:$0xff]   ;;  %v5324_v51 = vld [vmem:[%s6512_s3 + $0x10] sm:$0xff]  }
   0x4   :  { %v5325_v61 = vld [vmem:[%s6512_s3 + $0x18] sm:$0xff]   ;;  %v5326_v62 = vld [vmem:[%s6512_s3 + $0x20] sm:$0xff]   ;;  %v5327_v63 = vld [vmem:[%s6512_s3 + $0x28] sm:$0xff]  }
   0x8   :  { %v5569_v0 = vld [vmem:[%s6532_s26] sm:$0xff]   ;;  %v5574_v1 = vld [vmem:[%s6532_s26 + $0x8] sm:$0xff]   ;;  %v5584_v2 = vld [vmem:[%s6532_s26 + $0x10] sm:$0xff]  }
   0x9   :  { %4632 = vmatprep.subr.bf16.mxu1 %v5569_v0  ;;  %4608 = vmatprep.subr.bf16.mxu0 %v5569_v0  ;;  %v5591_v3 = vld [vmem:[%s6532_s26 + $0x18] sm:$0xff]   ;;  %v5296_v4 = vld [vmem:[%s6533_s20 + $0x20] sm:$0xff]   ;;  %v5617_v7 = vld [vmem:[%s6532_s26 + $0x28] sm:$0xff]  }
   0xa   :  { %4633 = vmatpush3.bf16.msra.mxu1 %v5569_v0  ;;  %4609 = vmatpush3.bf16.msra.mxu0 %v5569_v0  ;;  %v5603_v5 = vld [vmem:[%s6532_s26 + $0x20] sm:$0xff]   ;;  %v5626_v8 = vld [vmem:[%s6532_s26 + $0x30] sm:$0xff]   ;;  %v5635_v9 = vld [vmem:[%s6532_s26 + $0x38] sm:$0xff]  }
   0xb   :  { %4634 = vmatprep.subr.bf16.mxu1 %v5574_v1  ;;  %4610 = vmatprep.subr.bf16.mxu0 %v5574_v1  ;;  %v5300_v6 = vld [vmem:[%s6533_s20] sm:$0xff]   ;;  %v5297_v10 = vld [vmem:[%s6533_s20 + $0x28] sm:$0xff]   ;;  %v5298_v12 = vld [vmem:[%s6533_s20 + $0x30] sm:$0xff]  }
   0xc   :  { %4648 = vmatprep.mubr.bf16.mxu1 %v5296_v4  ;;  %4624 = vmatprep.mubr.bf16.mxu0 %v5300_v6  ;;  %v5301_v13 = vld [vmem:[%s6533_s20 + $0x8] sm:$0xff]   ;;  %v5302_v14 = vld [vmem:[%s6533_s20 + $0x10] sm:$0xff]   ;;  %v5299_v16 = vld [vmem:[%s6533_s20 + $0x38] sm:$0xff]  }
   0xd   :  { %v5303_v17 = vld [vmem:[%s6533_s20 + $0x18] sm:$0xff]   ;;  %v5304_v18 = vld [vmem:[%s6533_s20 + $0x40] sm:$0xff]   ;;  %v5305_v22 = vld [vmem:[%s6533_s20 + $0x48] sm:$0xff]  }
   0xe   :  { %4635 = vmatpush3.bf16.msra.mxu1 %v5574_v1  ;;  %4611 = vmatpush3.bf16.msra.mxu0 %v5574_v1  ;;  %v5306_v23 = vld [vmem:[%s6533_s20 + $0x50] sm:$0xff]   ;;  %v5307_v24 = vld [vmem:[%s6533_s20 + $0x58] sm:$0xff]   ;;  %v5308_v25 = vld [vmem:[%s6533_s20 + $0x60] sm:$0xff]  }
   0xf   :  { %4636 = vmatprep.subr.bf16.mxu1 %v5584_v2  ;;  %4612 = vmatprep.subr.bf16.mxu0 %v5584_v2  ;;  %v5309_v26 = vld [vmem:[%s6533_s20 + $0x68] sm:$0xff]   ;;  %v5310_v27 = vld [vmem:[%s6533_s20 + $0x70] sm:$0xff]   ;;  %v5311_v28 = vld [vmem:[%s6533_s20 + $0x78] sm:$0xff]  }
  0x10   :  { %v5312_v29 = vld [vmem:[%s6533_s20 + $0x80] sm:$0xff]   ;;  %v5313_v32 = vld [vmem:[%s6533_s20 + $0x88] sm:$0xff]   ;;  %v5314_v33 = vld [vmem:[%s6533_s20 + $0x90] sm:$0xff]  }
  0x11   :  { %v5315_v34 = vld [vmem:[%s6533_s20 + $0x98] sm:$0xff]   ;;  %v5330_v4 = vld [vmem:[%s6512_s3 + $0x70] sm:$0xff]  }
  0x12   :  { %4637 = vmatpush3.bf16.msra.mxu1 %v5584_v2  ;;  %4613 = vmatpush3.bf16.msra.mxu0 %v5584_v2 }
  0x13   :  { %4638 = vmatprep.subr.bf16.mxu1 %v5591_v3  ;;  %4614 = vmatprep.subr.bf16.mxu0 %v5591_v3 }
  0x16   :  { %4639 = vmatpush3.bf16.msra.mxu1 %v5591_v3  ;;  %4615 = vmatpush3.bf16.msra.mxu0 %v5591_v3 }
  0x17   :  { %4640 = vmatprep.subr.bf16.mxu1 %v5603_v5  ;;  %4616 = vmatprep.subr.bf16.mxu0 %v5603_v5 }
  0x1a   :  { %4641 = vmatpush3.bf16.msra.mxu1 %v5603_v5  ;;  %4617 = vmatpush3.bf16.msra.mxu0 %v5603_v5 }
  0x1b   :  { %4642 = vmatprep.subr.bf16.mxu1 %v5617_v7  ;;  %4618 = vmatprep.subr.bf16.mxu0 %v5617_v7 }
  0x1e   :  { %4643 = vmatpush3.bf16.msra.mxu1 %v5617_v7  ;;  %4619 = vmatpush3.bf16.msra.mxu0 %v5617_v7 }
  0x1f   :  { %4644 = vmatprep.subr.bf16.mxu1 %v5626_v8  ;;  %4620 = vmatprep.subr.bf16.mxu0 %v5626_v8 }
  0x22   :  { %4645 = vmatpush3.bf16.msra.mxu1 %v5626_v8  ;;  %4621 = vmatpush3.bf16.msra.mxu0 %v5626_v8 }
  0x23   :  { %4646 = vmatprep.subr.bf16.mxu1 %v5635_v9  ;;  %4622 = vmatprep.subr.bf16.mxu0 %v5635_v9 }
  0x26   :  { %4647 = vmatpush3.bf16.msra.mxu1 %v5635_v9  ;;  %4623 = vmatpush3.bf16.msra.mxu0 %v5635_v9 }
  0x27   :  { %4696 = vmatprep.subr.bf16.mxu1 %v5569_v0  ;;  %4656 = vmatprep.subr.bf16.mxu0 %v5316_v11 }
  0x29   :  { %4649 = vmatmul.mubr.bf16.vlgmr.msra.gmra.mrb[0].mxu1 %v5297_v10  ;;  %4625 = vmatmul.mubr.bf16.vlgmr.msra.gmra.mrb[0].mxu0 %v5301_v13 }
  0x2a   :  { %4697 = vmatpush3.bf16.msra.mxu1 %v5569_v0  ;;  %4652 = vmatprep.mubr.bf16.mxu1 %v5298_v12 }
  0x2b   :  { %4698 = vmatprep.subr.bf16.mxu1 %v5574_v1  ;;  %4628 = vmatprep.mubr.bf16.mxu0 %v5302_v14 }
  0x2c   :  { %4657 = vmatpush3.bf16.msra.mxu0 %v5316_v11  ;;  %v5332_v11 = vld [vmem:[%s6512_s3 + $0x80] sm:$0xff]  }
  0x2d   :  { %4658 = vmatprep.subr.bf16.mxu0 %v5317_v15 }
  0x2e   :  { %4699 = vmatpush3.bf16.msra.mxu1 %v5574_v1 }
  0x2f   :  { %4700 = vmatprep.subr.bf16.mxu1 %v5584_v2 }
  0x30   :  { %4659 = vmatpush3.bf16.msra.mxu0 %v5317_v15 }
  0x31   :  { %4653 = vmatmul.mubr.bf16.gmra.mrb[4].mxu1 %v5299_v16  ;;  %4629 = vmatmul.mubr.bf16.gmra.mrb[4].mxu0 %v5303_v17  ;;  %v5333_v17 = vld [vmem:[%s6512_s3 + $0x88] sm:$0xff]  }
  0x32   :  { %4701 = vmatpush3.bf16.msra.mxu1 %v5584_v2  ;;  %4712 = vmatprep.mubr.bf16.mxu1 %v5304_v18  ;;  %v5334_v18 = vld [vmem:[%s6512_s3 + $0x90] sm:$0xff]  }
  0x33   :  { %4702 = vmatprep.subr.bf16.mxu1 %v5591_v3  ;;  %4660 = vmatprep.subr.bf16.mxu0 %v5318_v19 }
  0x34   :  { %4661 = vmatpush3.bf16.msra.mxu0 %v5318_v19  ;;  %v5335_v19 = vld [vmem:[%s6512_s3 + $0x98] sm:$0xff]  }
  0x35   :  { %4662 = vmatprep.subr.bf16.mxu0 %v5319_v20 }
  0x36   :  { %4703 = vmatpush3.bf16.msra.mxu1 %v5591_v3 }
  0x37   :  { %4704 = vmatprep.subr.bf16.mxu1 %v5603_v5 }
  0x38   :  { %4663 = vmatpush3.bf16.msra.mxu0 %v5319_v20  ;;  %v5336_v20 = vld [vmem:[%s6512_s3 + $0xa0] sm:$0xff]  }
  0x39   :  { %4664 = vmatprep.subr.bf16.mxu0 %v5320_v21 }
  0x3a   :  { %4705 = vmatpush3.bf16.msra.mxu1 %v5603_v5 }
  0x3b   :  { %4706 = vmatprep.subr.bf16.mxu1 %v5617_v7 }
  0x3c   :  { %4665 = vmatpush3.bf16.msra.mxu0 %v5320_v21  ;;  %v5337_v21 = vld [vmem:[%s6512_s3 + $0xa8] sm:$0xff]  }
  0x3d   :  { %4666 = vmatprep.subr.bf16.mxu0 %v5321_v30 }
  0x3e   :  { %4707 = vmatpush3.bf16.msra.mxu1 %v5617_v7 }
  0x3f   :  { %4708 = vmatprep.subr.bf16.mxu1 %v5626_v8 }
  0x40   :  { %4667 = vmatpush3.bf16.msra.mxu0 %v5321_v30 }
  0x41   :  { %4676 = vmatprep.subr.bf16.mxu0 %v5322_v31 }
  0x42   :  { %4709 = vmatpush3.bf16.msra.mxu1 %v5626_v8 }
  0x43   :  { %4710 = vmatprep.subr.bf16.mxu1 %v5635_v9 }
  0x46   :  { %4711 = vmatpush3.bf16.msra.mxu1 %v5635_v9 }
  0x47   :  { %4740 = vmatprep.subr.bf16.mxu1 %v5569_v0 }
  0x49   :  { %4713 = vmatmul.mubr.bf16.vlgmr.msra.gmra.mrb[8].mxu1 %v5305_v22 }
  0x4a   :  { %4741 = vmatpush3.bf16.msra.mxu1 %v5569_v0  ;;  %4716 = vmatprep.mubr.bf16.mxu1 %v5306_v23 }
  0x4b   :  { %4742 = vmatprep.subr.bf16.mxu1 %v5574_v1 }
  0x4e   :  { %4743 = vmatpush3.bf16.msra.mxu1 %v5574_v1 }
  0x4f   :  { %4744 = vmatprep.subr.bf16.mxu1 %v5584_v2 }
  0x51   :  { %4717 = vmatmul.mubr.bf16.gmra.mrb[12].mxu1 %v5307_v24  ;;  %v5338_v24 = vld [vmem:[%s6512_s3 + $0xb0] sm:$0xff]  }
  0x52   :  { %4745 = vmatpush3.bf16.msra.mxu1 %v5584_v2  ;;  %4756 = vmatprep.mubr.bf16.mxu1 %v5308_v25 }
  0x53   :  { %4746 = vmatprep.subr.bf16.mxu1 %v5591_v3 }
  0x56   :  { %4747 = vmatpush3.bf16.msra.mxu1 %v5591_v3 }
  0x57   :  { %4748 = vmatprep.subr.bf16.mxu1 %v5603_v5 }
  0x5a   :  { %4749 = vmatpush3.bf16.msra.mxu1 %v5603_v5 }
  0x5b   :  { %4750 = vmatprep.subr.bf16.mxu1 %v5617_v7 }
  0x5e   :  { %4751 = vmatpush3.bf16.msra.mxu1 %v5617_v7 }
  0x5f   :  { %4752 = vmatprep.subr.bf16.mxu1 %v5626_v8 }
  0x62   :  { %4753 = vmatpush3.bf16.msra.mxu1 %v5626_v8 }
  0x63   :  { %4754 = vmatprep.subr.bf16.mxu1 %v5635_v9 }
  0x66   :  { %4755 = vmatpush3.bf16.msra.mxu1 %v5635_v9 }
  0x67   :  { %4784 = vmatprep.subr.bf16.mxu1 %v5569_v0 }
  0x69   :  { %4757 = vmatmul.mubr.bf16.vlgmr.msra.gmra.mrb[16].mxu1 %v5309_v26 }
  0x6a   :  { %4785 = vmatpush3.bf16.msra.mxu1 %v5569_v0  ;;  %4760 = vmatprep.mubr.bf16.mxu1 %v5310_v27  ;;  %v5328_v0 = vld [vmem:[%s6512_s3 + $0x60] sm:$0xff]  }
  0x6b   :  { %4786 = vmatprep.subr.bf16.mxu1 %v5574_v1 }
  0x6e   :  { %4787 = vmatpush3.bf16.msra.mxu1 %v5574_v1  ;;  %v5329_v1 = vld [vmem:[%s6512_s3 + $0x68] sm:$0xff]  }
  0x6f   :  { %4788 = vmatprep.subr.bf16.mxu1 %v5584_v2 }
  0x71   :  { %4761 = vmatmul.mubr.bf16.gmra.mrb[20].mxu1 %v5311_v28 }
  0x72   :  { %4789 = vmatpush3.bf16.msra.mxu1 %v5584_v2  ;;  %4800 = vmatprep.mubr.bf16.mxu1 %v5312_v29  ;;  %v5339_v29 = vld [vmem:[%s6512_s3 + $0xb8] sm:$0xff]  }
  0x73   :  { %4790 = vmatprep.subr.bf16.mxu1 %v5591_v3 }
  0x76   :  { %4791 = vmatpush3.bf16.msra.mxu1 %v5591_v3 }
  0x77   :  { %4792 = vmatprep.subr.bf16.mxu1 %v5603_v5 }
  0x7a   :  { %4793 = vmatpush3.bf16.msra.mxu1 %v5603_v5 }
  0x7b   :  { %4794 = vmatprep.subr.bf16.mxu1 %v5617_v7 }
  0x7e   :  { %4795 = vmatpush3.bf16.msra.mxu1 %v5617_v7 }
  0x7f   :  { %4796 = vmatprep.subr.bf16.mxu1 %v5626_v8 }
  0x82   :  { %4797 = vmatpush3.bf16.msra.mxu1 %v5626_v8 }
  0x83   :  { %4798 = vmatprep.subr.bf16.mxu1 %v5635_v9 }
  0x86   :  { %4799 = vmatpush3.bf16.msra.mxu1 %v5635_v9  ;;  %v5331_v9 = vld [vmem:[%s6512_s3 + $0x78] sm:$0xff]  }
  0x89   :  { %4801 = vmatmul.mubr.bf16.vlgmr.msra.gmra.mrb[24].mxu1 %v5313_v32 }
  0x8a   :  { %4804 = vmatprep.mubr.bf16.mxu1 %v5314_v33 }
  0x91   :  { %4805 = vmatmul.mubr.bf16.gmra.mrb[28].mxu1 %v5315_v34 }
  0xfc   :  { %v4650_v35 = vpop.f32.mrb[0].mxu1  ;;  %v4626_v36 = vpop.f32.mrb[0].mxu0 }
  0xfd   :  { %v302_v37 = vpop.f32.mrb[1].mxu1  ;;  %v188_v38 = vpop.f32.mrb[1].mxu0 }
  0xfe   :  { %v4651_v39 = vpop.f32.mrb[2].mxu1  ;;  %v4627_v40 = vpop.f32.mrb[2].mxu0 }
  0xff   :  { %v334_v41 = vpack.c.bf16 %v4651_v39, %v4650_v35  ;;  %v305_v42 = vpop.f32.mrb[3].mxu1  ;;  %v220_v43 = vpack.c.bf16 %v4627_v40, %v4626_v36  ;;  %v191_v44 = vpop.f32.mrb[3].mxu0  ;;  %v5343_v39 = vld [vmem:[%s6512_s3 + $0xd8] sm:$0xff]   ;;  %v5344_v40 = vld [vmem:[%s6512_s3 + $0xe0] sm:$0xff]  }
 0x100   :  { %v333_v45 = vpack.c.bf16 %v305_v42, %v302_v37  ;;  %v219_v46 = vpack.c.bf16 %v191_v44, %v188_v38  ;;  %v5341_v37 = vld [vmem:[%s6512_s3 + $0xc8] sm:$0xff]   ;;  %v5342_v38 = vld [vmem:[%s6512_s3 + $0xd0] sm:$0xff]  }
 0x102   :  { %4668 = vmatprep.mubr.msk.bf16.mxu0 %vm386_vm0, %v333_v45 }
 0x103   :  { %4669 = vmatmul.mubr.msk.bf16.vlgmr.msra.gmra.mrb[8].mxu0 %vm386_vm0, %v334_v41  ;;  %v5345_v41 = vld [vmem:[%s6512_s3 + $0xe8] sm:$0xff]  }
 0x104   :  { %4677 = vmatpush3.bf16.msra.mxu0 %v5322_v31  ;;  %v4654_v48 = vpop.f32.mrb[4].mxu1  ;;  %v4630_v49 = vpop.f32.mrb[4].mxu0  ;;  %v5340_v31 = vld [vmem:[%s6512_s3 + $0xc0] sm:$0xff]  }
 0x105   :  { %4678 = vmatprep.subr.bf16.mxu0 %v5323_v47  ;;  %v318_v50 = vpop.f32.mrb[5].mxu1  ;;  %v204_v52 = vpop.f32.mrb[5].mxu0 }
 0x106   :  { %v4655_v53 = vpop.f32.mrb[6].mxu1  ;;  %v4631_v54 = vpop.f32.mrb[6].mxu0 }
 0x107   :  { %v336_v55 = vpack.c.bf16 %v4655_v53, %v4654_v48  ;;  %v321_v56 = vpop.f32.mrb[7].mxu1  ;;  %v222_v57 = vpack.c.bf16 %v4631_v54, %v4630_v49  ;;  %v207_v58 = vpop.f32.mrb[7].mxu0  ;;  %v5346_v54 = vld [vmem:[%s6513_s5 + $0x10] sm:$0xff]  }
 0x108   :  { %4679 = vmatpush3.bf16.msra.mxu0 %v5323_v47  ;;  %v335_v59 = vpack.c.bf16 %v321_v56, %v318_v50  ;;  %v221_v60 = vpack.c.bf16 %v207_v58, %v204_v52  ;;  %4848 = vmatprep.mubr.msk.bf16.mxu1 %vm1342_vm1, %v5346_v54  ;;  %v3957_v56 = vld [vmem:[%s6515_s4] ss:$0 sm:$0xff] }
 0x109   :  { %4680 = vmatprep.subr.bf16.mxu0 %v5324_v51 }
 0x10a   :  { %4672 = vmatprep.mubr.msk.bf16.mxu0 %vm386_vm0, %v335_v59 }
 0x10b   :  { %4673 = vmatmul.mubr.msk.bf16.gmra.mrb[12].mxu0 %vm386_vm0, %v336_v55  ;;  %v5350_v55 = vld [vmem:[%s6513_s5] sm:$0xff]  }
 0x10c   :  { %4681 = vmatpush3.bf16.msra.mxu0 %v5324_v51  ;;  %4688 = vmatprep.mubr.msk.bf16.mxu0 %vm386_vm0, %v219_v46 }
 0x10d   :  { %4682 = vmatprep.subr.bf16.mxu0 %v5325_v61 }
 0x110   :  { %4683 = vmatpush3.bf16.msra.mxu0 %v5325_v61 }
 0x111   :  { %4684 = vmatprep.subr.bf16.mxu0 %v5326_v62 }
 0x114   :  { %4685 = vmatpush3.bf16.msra.mxu0 %v5326_v62 }
 0x115   :  { %4686 = vmatprep.subr.bf16.mxu0 %v5327_v63 }
 0x118   :  { %4687 = vmatpush3.bf16.msra.mxu0 %v5327_v63 }
 0x119   :  { %4720 = vmatprep.subr.bf16.mxu0 %v5328_v0 }
 0x11b   :  { %4689 = vmatmul.mubr.msk.bf16.vlgmr.msra.gmra.mrb[8].mxu0 %vm386_vm0, %v220_v43 }
 0x11c   :  { %4721 = vmatpush3.bf16.msra.mxu0 %v5328_v0  ;;  %v4714_v2 = vpop.f32.mrb[8].mxu1  ;;  %4692 = vmatprep.mubr.msk.bf16.mxu0 %vm386_vm0, %v221_v60 }
 0x11d   :  { %v644_v3 = vpop.f32.mrb[9].mxu1  ;;  %4722 = vmatprep.subr.bf16.mxu0 %v5329_v1 }
 0x11e   :  { %v4715_v5 = vpop.f32.mrb[10].mxu1 }
 0x11f   :  { %v676_v6 = vpack.c.bf16 %v4715_v5, %v4714_v2  ;;  %v647_v7 = vpop.f32.mrb[11].mxu1 }
 0x120   :  { %v675_v8 = vpack.c.bf16 %v647_v7, %v644_v3  ;;  %4723 = vmatpush3.bf16.msra.mxu0 %v5329_v1 }
 0x121   :  { %4724 = vmatprep.subr.bf16.mxu0 %v5330_v4 }
 0x123   :  { %4693 = vmatmul.mubr.msk.bf16.gmra.mrb[12].mxu0 %vm386_vm0, %v222_v57 }
 0x124   :  { %4725 = vmatpush3.bf16.msra.mxu0 %v5330_v4  ;;  %4732 = vmatprep.mubr.msk.bf16.mxu0 %vm386_vm0, %v675_v8  ;;  %v4718_v10 = vpop.f32.mrb[12].mxu1 }
 0x125   :  { %4726 = vmatprep.subr.bf16.mxu0 %v5331_v9  ;;  %v660_v12 = vpop.f32.mrb[13].mxu1 }
 0x126   :  { %v4719_v13 = vpop.f32.mrb[14].mxu1 }
 0x127   :  { %v678_v14 = vpack.c.bf16 %v4719_v13, %v4718_v10  ;;  %v663_v15 = vpop.f32.mrb[15].mxu1 }
 0x128   :  { %4727 = vmatpush3.bf16.msra.mxu0 %v5331_v9  ;;  %v677_v16 = vpack.c.bf16 %v663_v15, %v660_v12 }
 0x129   :  { %4728 = vmatprep.subr.bf16.mxu0 %v5332_v11 }
 0x12c   :  { %4729 = vmatpush3.bf16.msra.mxu0 %v5332_v11 }
 0x12d   :  { %4730 = vmatprep.subr.bf16.mxu0 %v5333_v17 }
 0x130   :  { %4731 = vmatpush3.bf16.msra.mxu0 %v5333_v17 }
 0x131   :  { %4764 = vmatprep.subr.bf16.mxu0 %v5334_v18 }
 0x133   :  { %4733 = vmatmul.mubr.msk.bf16.vlgmr.msra.gmra.mrb[8].mxu0 %vm386_vm0, %v676_v6 }
 0x134   :  { %4765 = vmatpush3.bf16.msra.mxu0 %v5334_v18  ;;  %4736 = vmatprep.mubr.msk.bf16.mxu0 %vm386_vm0, %v677_v16 }
 0x135   :  { %4766 = vmatprep.subr.bf16.mxu0 %v5335_v19 }
 0x138   :  { %4767 = vmatpush3.bf16.msra.mxu0 %v5335_v19 }
 0x139   :  { %4768 = vmatprep.subr.bf16.mxu0 %v5336_v20 }
 0x13b   :  { %4737 = vmatmul.mubr.msk.bf16.gmra.mrb[12].mxu0 %vm386_vm0, %v678_v14 }
 0x13c   :  { %4769 = vmatpush3.bf16.msra.mxu0 %v5336_v20  ;;  %v4758_v22 = vpop.f32.mrb[16].mxu1 }
 0x13d   :  { %v880_v23 = vpop.f32.mrb[17].mxu1  ;;  %4770 = vmatprep.subr.bf16.mxu0 %v5337_v21 }
 0x13e   :  { %v4759_v25 = vpop.f32.mrb[18].mxu1 }
 0x13f   :  { %v912_v26 = vpack.c.bf16 %v4759_v25, %v4758_v22  ;;  %v883_v27 = vpop.f32.mrb[19].mxu1 }
 0x140   :  { %v911_v28 = vpack.c.bf16 %v883_v27, %v880_v23  ;;  %4771 = vmatpush3.bf16.msra.mxu0 %v5337_v21 }
 0x141   :  { %4772 = vmatprep.subr.bf16.mxu0 %v5338_v24 }
 0x142   :  { %4776 = vmatprep.mubr.msk.bf16.mxu0 %vm386_vm0, %v911_v28 }
 0x144   :  { %4773 = vmatpush3.bf16.msra.mxu0 %v5338_v24  ;;  %v4762_v30 = vpop.f32.mrb[20].mxu1 }
 0x145   :  { %4774 = vmatprep.subr.bf16.mxu0 %v5339_v29  ;;  %v896_v32 = vpop.f32.mrb[21].mxu1 }
 0x146   :  { %v4763_v33 = vpop.f32.mrb[22].mxu1 }
 0x147   :  { %v914_v34 = vpack.c.bf16 %v4763_v33, %v4762_v30  ;;  %v899_v35 = vpop.f32.mrb[23].mxu1  ;;  %v5347_v30 = vld [vmem:[%s6513_s5 + $0x18] sm:$0xff]   ;;  %v5357_v33 = vld [vmem:[%s6514_s6 + $0x48] sm:$0xff]  }
 0x148   :  { %4775 = vmatpush3.bf16.msra.mxu0 %v5339_v29  ;;  %v913_v36 = vpack.c.bf16 %v899_v35, %v896_v32  ;;  %v5356_v29 = vld [vmem:[%s6514_s6 + $0x40] sm:$0xff]   ;;  %v5359_v35 = vld [vmem:[%s6514_s6 + $0x58] sm:$0xff]  }
 0x149   :  { %4808 = vmatprep.subr.bf16.mxu0 %v5340_v31  ;;  %v5348_v32 = vld [vmem:[%s6513_s5 + $0x20] sm:$0xff]  }
 0x14b   :  { %4777 = vmatmul.mubr.msk.bf16.vlgmr.msra.gmra.mrb[8].mxu0 %vm386_vm0, %v912_v26 }
 0x14c   :  { %4809 = vmatpush3.bf16.msra.mxu0 %v5340_v31  ;;  %4780 = vmatprep.mubr.msk.bf16.mxu0 %vm386_vm0, %v913_v36  ;;  %v5351_v31 = vld [vmem:[%s6513_s5 + $0x8] sm:$0xff]   ;;  %v5360_v36 = vld [vmem:[%s6514_s6 + $0x60] sm:$0xff]  }
 0x14d   :  { %4810 = vmatprep.subr.bf16.mxu0 %v5341_v37 }
 0x150   :  { %4811 = vmatpush3.bf16.msra.mxu0 %v5341_v37  ;;  %v5349_v37 = vld [vmem:[%s6513_s5 + $0x28] sm:$0xff]  }
 0x151   :  { %4812 = vmatprep.subr.bf16.mxu0 %v5342_v38 }
 0x153   :  { %4781 = vmatmul.mubr.msk.bf16.gmra.mrb[12].mxu0 %vm386_vm0, %v914_v34  ;;  %v5358_v34 = vld [vmem:[%s6514_s6 + $0x50] sm:$0xff]  }
 0x154   :  { %4813 = vmatpush3.bf16.msra.mxu0 %v5342_v38  ;;  %v5352_v38 = vld [vmem:[%s6513_s5 + $0x30] sm:$0xff]  }
 0x155   :  { %4814 = vmatprep.subr.bf16.mxu0 %v5343_v39 }
 0x158   :  { %4815 = vmatpush3.bf16.msra.mxu0 %v5343_v39  ;;  %v5361_v39 = vld [vmem:[%s6514_s6 + $0x68] sm:$0xff]  }
 0x159   :  { %4816 = vmatprep.subr.bf16.mxu0 %v5344_v40 }
 0x15c   :  { %v4802_v42 = vpop.f32.mrb[24].mxu1  ;;  %4817 = vmatpush3.bf16.msra.mxu0 %v5344_v40  ;;  %v5362_v40 = vld [vmem:[%s6514_s6 + $0x70] sm:$0xff]  }
 0x15d   :  { %v1116_v43 = vpop.f32.mrb[25].mxu1  ;;  %4818 = vmatprep.subr.bf16.mxu0 %v5345_v41 }
 0x15e   :  { %v4803_v44 = vpop.f32.mrb[26].mxu1 }
 0x15f   :  { %v1148_v45 = vpack.c.bf16 %v4803_v44, %v4802_v42  ;;  %v1119_v46 = vpop.f32.mrb[27].mxu1  ;;  %v5354_v42 = vld [vmem:[%s6513_s5 + $0x40] sm:$0xff]   ;;  %v5363_v44 = vld [vmem:[%s6514_s6 + $0x78] sm:$0xff]  }
 0x160   :  { %v1147_v47 = vpack.c.bf16 %v1119_v46, %v1116_v43  ;;  %4819 = vmatpush3.bf16.msra.mxu0 %v5345_v41  ;;  %v5353_v41 = vld [vmem:[%s6513_s5 + $0x38] sm:$0xff]   ;;  %v5355_v43 = vld [vmem:[%s6513_s5 + $0x48] sm:$0xff]  }
 0x162   :  { %4820 = vmatprep.mubr.msk.bf16.mxu0 %vm386_vm0, %v1147_v47 }
 0x163   :  { %4821 = vmatmul.mubr.msk.bf16.vlgmr.msra.gmra.mrb[8].mxu0 %vm386_vm0, %v1148_v45  ;;  %v5364_v45 = vld [vmem:[%s6514_s6] sm:$0xff]  }
 0x164   :  { %v4806_v48 = vpop.f32.mrb[28].mxu1 }
 0x165   :  { %v1132_v49 = vpop.f32.mrb[29].mxu1 }
 0x166   :  { %v4807_v50 = vpop.f32.mrb[30].mxu1 }
 0x167   :  { %v1150_v51 = vpack.c.bf16 %v4807_v50, %v4806_v48  ;;  %v1135_v52 = vpop.f32.mrb[31].mxu1 }
 0x168   :  { %v1149_v53 = vpack.c.bf16 %v1135_v52, %v1132_v49 }
 0x16a   :  { %4824 = vmatprep.mubr.msk.bf16.mxu0 %vm386_vm0, %v1149_v53 }
 0x16b   :  { %4825 = vmatmul.mubr.msk.bf16.gmra.mrb[12].mxu0 %vm386_vm0, %v1150_v51  ;;  %vm3114_vm0 = vcmask 130048  }
 0x16c   :  { %4836 = vmatprep.mubr.msk.bf16.mxu0 %vm1342_vm1, %v5350_v55 }
 0x236   :  { %v4822_v57 = vpop.f32.mrb[8].mxu0 }
 0x237   :  { %v1294_v58 = vadd.f32 %v4822_v57, %v3957_v56  ;;  %v1246_v59 = vpop.f32.mrb[9].mxu0 }
 0x238   :  { %v1292_v60 = vadd.f32 %v3957_v56, %v1246_v59  ;;  %v4823_v61 = vpop.f32.mrb[10].mxu0  ;;  %v5366_v59 = vld [vmem:[%s6514_s6 + $0x10] sm:$0xff]  }
 0x239   :  { %v1310_v62 = vmul.f32 0.01, %v1294_v58  ;;  %v1295_v63 = vadd.f32 %v4823_v61, %v3957_v56  ;;  %v1249_v0 = vpop.f32.mrb[11].mxu0  ;;  %vm1302_vm2 = vcmp.gt.f32.partialorder %v1294_v58, 0.0 }
 0x23a   :  { %v1308_v1 = vmul.f32 0.01, %v1292_v60  ;;  %v1293_v2 = vadd.f32 %v3957_v56, %v1249_v0  ;;  %vm1300_vm3 = vcmp.gt.f32.partialorder %v1292_v60, 0.0 }
 0x23b   :  { %vm1303_vm4 = vcmp.gt.f32.partialorder %v1295_v63, 0.0  ;;  %v1311_v3 = vmul.f32 0.01, %v1295_v63  ;;  %v1318_v5 = vsel %vm1302_vm2, %v1294_v58, %v1310_v62  ;;  %v5365_v58 = vld [vmem:[%s6514_s6 + $0x8] sm:$0xff]   ;;  %v5368_v62 = vld [vmem:[%s6514_s6 + $0x20] sm:$0xff]  }
 0x23c   :  { %vm1301_vm5 = vcmp.gt.f32.partialorder %v1293_v2, 0.0  ;;  %v1309_v4 = vmul.f32 0.01, %v1293_v2  ;;  %v1316_v7 = vsel %vm1300_vm3, %v1292_v60, %v1308_v1  ;;  %v5367_v60 = vld [vmem:[%s6514_s6 + $0x18] sm:$0xff]  }
 0x23d   :  { %v1319_v6 = vsel %vm1303_vm4, %v1295_v63, %v1311_v3  ;;  %vm3786_vm4 = vcmask 1043456  }
 0x23e   :  { %v5867_v8 = vpack.c.bf16 %v1319_v6, %v1318_v5  ;;  %v1317_v9 = vsel %vm1301_vm5, %v1293_v2, %v1309_v4  ;;  %v4826_v10 = vpop.f32.mrb[12].mxu0  ;;  %v5369_v4 = vld [vmem:[%s6514_s6 + $0x28] sm:$0xff]   ;;  %v5370_v5 = vld [vmem:[%s6514_s6 + $0x30] sm:$0xff]   ;;  %v5371_v6 = vld [vmem:[%s6514_s6 + $0x38] sm:$0xff]   ;;  %vm3793_vm5 = vcmask 3072  }
 0x23f   :  { %v5869_v11 = vpack.c.bf16 %v1317_v9, %v1316_v7  ;;  %v1298_v12 = vadd.f32 %v4826_v10, %v3957_v56  ;;  %v1262_v13 = vpop.f32.mrb[13].mxu0 }
 0x240   :  { %v1296_v14 = vadd.f32 %v3957_v56, %v1262_v13  ;;  %v4827_v15 = vpop.f32.mrb[14].mxu0 }
 0x241   :  { %v1314_v16 = vmul.f32 0.01, %v1298_v12  ;;  %v1299_v17 = vadd.f32 %v4827_v15, %v3957_v56  ;;  %v1265_v18 = vpop.f32.mrb[15].mxu0  ;;  %4828 = vmatprep.subr.bf16.mxu0 %v5869_v11  ;;  %4840 = vmatprep.subr.bf16.mxu1 %v5869_v11  ;;  %vm1306_vm6 = vcmp.gt.f32.partialorder %v1298_v12, 0.0  ;;  %v5374_v15 = vld [vmem:[%s6514_s6 + $0x90] sm:$0xff]  }
 0x242   :  { %v1312_v19 = vmul.f32 0.01, %v1296_v14  ;;  %v1297_v20 = vadd.f32 %v3957_v56, %v1265_v18  ;;  %4829 = vmatpush3.bf16.msra.mxu0 %v5869_v11  ;;  %4841 = vmatpush3.bf16.msra.mxu1 %v5869_v11  ;;  %vm1304_vm7 = vcmp.gt.f32.partialorder %v1296_v14, 0.0  ;;  %v5376_v18 = vld [vmem:[%s6514_s6 + $0xa0] sm:$0xff]  }
 0x243   :  { %vm1307_vm8 = vcmp.gt.f32.partialorder %v1299_v17, 0.0  ;;  %v1315_v21 = vmul.f32 0.01, %v1299_v17  ;;  %4830 = vmatprep.subr.bf16.mxu0 %v5867_v8  ;;  %4842 = vmatprep.subr.bf16.mxu1 %v5867_v8  ;;  %v1322_v23 = vsel %vm1306_vm6, %v1298_v12, %v1314_v16  ;;  %v5375_v16 = vld [vmem:[%s6514_s6 + $0x98] sm:$0xff]  }
 0x244   :  { %vm1305_vm9 = vcmp.gt.f32.partialorder %v1297_v20, 0.0  ;;  %v1313_v22 = vmul.f32 0.01, %v1297_v20  ;;  %v1320_v25 = vsel %vm1304_vm7, %v1296_v14, %v1312_v19  ;;  %v5373_v14 = vld [vmem:[%s6514_s6 + $0x88] sm:$0xff]  }
 0x245   :  { %v1323_v24 = vsel %vm1307_vm8, %v1299_v17, %v1315_v21 }
 0x246   :  { %v5877_v26 = vpack.c.bf16 %v1323_v24, %v1322_v23  ;;  %v1321_v27 = vsel %vm1305_vm9, %v1297_v20, %v1313_v22  ;;  %4831 = vmatpush3.bf16.msra.mxu0 %v5867_v8  ;;  %4843 = vmatpush3.bf16.msra.mxu1 %v5867_v8  ;;  %v5377_v24 = vld [vmem:[%s6514_s6 + $0xa8] sm:$0xff]  }
 0x247   :  { %v5881_v28 = vpack.c.bf16 %v1321_v27, %v1320_v25  ;;  %v5378_v25 = vld [vmem:[%s6514_s6 + $0xb0] sm:$0xff]   ;;  %v5380_v27 = vld [vmem:[%s6514_s6 + $0xc0] sm:$0xff]  }
 0x249   :  { %4832 = vmatprep.subr.bf16.mxu0 %v5881_v28  ;;  %4844 = vmatprep.subr.bf16.mxu1 %v5881_v28 }
 0x24a   :  { %4833 = vmatpush3.bf16.msra.mxu0 %v5881_v28  ;;  %4845 = vmatpush3.bf16.msra.mxu1 %v5881_v28 }
 0x24b   :  { %4834 = vmatprep.subr.bf16.mxu0 %v5877_v26  ;;  %4846 = vmatprep.subr.bf16.mxu1 %v5877_v26 }
 0x24e   :  { %4835 = vmatpush3.bf16.msra.mxu0 %v5877_v26  ;;  %4847 = vmatpush3.bf16.msra.mxu1 %v5877_v26 }
 0x24f   :  { %4892 = vmatprep.subr.bf16.mxu1 %v5869_v11  ;;  %4852 = vmatprep.subr.bf16.mxu0 %v5356_v29 }
 0x251   :  { %4849 = vmatmul.mubr.msk.bf16.vlgmr.msra.gmra.mrb[32].mxu1 %vm1342_vm1, %v5347_v30  ;;  %4837 = vmatmul.mubr.msk.bf16.vlgmr.msra.gmra.mrb[16].mxu0 %vm1342_vm1, %v5351_v31  ;;  %v5383_v30 = vld [vmem:[%s6514_s6 + $0xd8] sm:$0xff]   ;;  %v5384_v31 = vld [vmem:[%s6514_s6 + $0xe0] sm:$0xff]  }
 0x252   :  { %4893 = vmatpush3.bf16.msra.mxu1 %v5869_v11  ;;  %4900 = vmatprep.mubr.msk.bf16.mxu1 %vm1342_vm1, %v5348_v32  ;;  %v5385_v32 = vld [vmem:[%s6514_s6 + $0xe8] sm:$0xff]  }
 0x253   :  { %4894 = vmatprep.subr.bf16.mxu1 %v5867_v8  ;;  %4853 = vmatpush3.bf16.msra.mxu0 %v5356_v29  ;;  %v5382_v29 = vld [vmem:[%s6514_s6 + $0xd0] sm:$0xff]  }
 0x254   :  { %4854 = vmatprep.subr.bf16.mxu0 %v5357_v33 }
 0x256   :  { %4895 = vmatpush3.bf16.msra.mxu1 %v5867_v8 }
 0x257   :  { %4896 = vmatprep.subr.bf16.mxu1 %v5881_v28  ;;  %4855 = vmatpush3.bf16.msra.mxu0 %v5357_v33  ;;  %v5386_v33 = vld [vmem:[%s6514_s6 + $0xf0] sm:$0xff]  }
 0x258   :  { %4856 = vmatprep.subr.bf16.mxu0 %v5358_v34 }
 0x25a   :  { %4897 = vmatpush3.bf16.msra.mxu1 %v5881_v28 }
 0x25b   :  { %4898 = vmatprep.subr.bf16.mxu1 %v5877_v26  ;;  %4857 = vmatpush3.bf16.msra.mxu0 %v5358_v34  ;;  %v5387_v34 = vld [vmem:[%s6514_s6 + $0xf8] sm:$0xff]  }
 0x25c   :  { %4858 = vmatprep.subr.bf16.mxu0 %v5359_v35 }
 0x25e   :  { %4899 = vmatpush3.bf16.msra.mxu1 %v5877_v26 }
 0x25f   :  { %4924 = vmatprep.subr.bf16.mxu1 %v5869_v11  ;;  %4859 = vmatpush3.bf16.msra.mxu0 %v5359_v35  ;;  %v5388_v35 = vld [vmem:[%s6514_s6 + $0x100] sm:$0xff]  }
 0x260   :  { %4860 = vmatprep.subr.bf16.mxu0 %v5360_v36 }
 0x261   :  { %4901 = vmatmul.mubr.msk.bf16.vlgmr.msra.gmra.mrb[36].mxu1 %vm1342_vm1, %v5349_v37  ;;  %v5390_v37 = vld [vmem:[%s6514_s6 + $0x110] sm:$0xff]  }
 0x262   :  { %4925 = vmatpush3.bf16.msra.mxu1 %v5869_v11  ;;  %4932 = vmatprep.mubr.msk.bf16.mxu1 %vm1342_vm1, %v5352_v38  ;;  %v5391_v38 = vld [vmem:[%s6514_s6 + $0x118] sm:$0xff]  }
 0x263   :  { %4926 = vmatprep.subr.bf16.mxu1 %v5867_v8  ;;  %4861 = vmatpush3.bf16.msra.mxu0 %v5360_v36  ;;  %v5389_v36 = vld [vmem:[%s6514_s6 + $0x108] sm:$0xff]  }
 0x264   :  { %4862 = vmatprep.subr.bf16.mxu0 %v5361_v39 }
 0x266   :  { %4927 = vmatpush3.bf16.msra.mxu1 %v5867_v8 }
 0x267   :  { %4928 = vmatprep.subr.bf16.mxu1 %v5881_v28  ;;  %4863 = vmatpush3.bf16.msra.mxu0 %v5361_v39  ;;  %v5392_v39 = vld [vmem:[%s6514_s6 + $0x120] sm:$0xff]  }
 0x268   :  { %4864 = vmatprep.subr.bf16.mxu0 %v5362_v40 }
 0x26a   :  { %4929 = vmatpush3.bf16.msra.mxu1 %v5881_v28 }
 0x26b   :  { %4930 = vmatprep.subr.bf16.mxu1 %v5877_v26  ;;  %4865 = vmatpush3.bf16.msra.mxu0 %v5362_v40  ;;  %v5393_v40 = vld [vmem:[%s6514_s6 + $0x128] sm:$0xff]  }
 0x26c   :  { %4866 = vmatprep.subr.bf16.mxu0 %v5363_v44 }
 0x26e   :  { %4931 = vmatpush3.bf16.msra.mxu1 %v5877_v26 }
 0x26f   :  { %4956 = vmatprep.subr.bf16.mxu1 %v5869_v11  ;;  %4867 = vmatpush3.bf16.msra.mxu0 %v5363_v44  ;;  %v4098_v44 = vld [vmem:[%s6518_s7] ss:$0 sm:$0xff] }
 0x270   :  { %4872 = vmatprep.subr.bf16.mxu0 %v5364_v45 }
 0x271   :  { %4933 = vmatmul.mubr.msk.bf16.vlgmr.msra.gmra.mrb[40].mxu1 %vm1342_vm1, %v5353_v41  ;;  %v5394_v41 = vld [vmem:[%s6514_s6 + $0x130] sm:$0xff]  }
 0x272   :  { %4957 = vmatpush3.bf16.msra.mxu1 %v5869_v11  ;;  %4964 = vmatprep.mubr.msk.bf16.mxu1 %vm1342_vm1, %v5354_v42  ;;  %v5395_v42 = vld [vmem:[%s6514_s6 + $0x138] sm:$0xff]  }
 0x273   :  { %4958 = vmatprep.subr.bf16.mxu1 %v5867_v8 }
 0x276   :  { %4959 = vmatpush3.bf16.msra.mxu1 %v5867_v8  ;;  %v5372_v8 = vld [vmem:[%s6514_s6 + $0x80] sm:$0xff]  }
 0x277   :  { %4960 = vmatprep.subr.bf16.mxu1 %v5881_v28 }
 0x27a   :  { %4961 = vmatpush3.bf16.msra.mxu1 %v5881_v28  ;;  %v5381_v28 = vld [vmem:[%s6514_s6 + $0xc8] sm:$0xff]  }
 0x27b   :  { %4962 = vmatprep.subr.bf16.mxu1 %v5877_v26 }
 0x27e   :  { %4963 = vmatpush3.bf16.msra.mxu1 %v5877_v26  ;;  %v5379_v26 = vld [vmem:[%s6514_s6 + $0xb8] sm:$0xff]  }
 0x281   :  { %4965 = vmatmul.mubr.msk.bf16.vlgmr.msra.gmra.mrb[44].mxu1 %vm1342_vm1, %v5355_v43  ;;  %v5474_v43 = vmov 0.0  }
 0x282   :  { %4988 = vmatprep.subr.bf16.mxu1 %v5474_v43  ;;  %4992 = vmatprep.mubr.msk.bf16.mxu1 %vm5475_vm10, %v5474_v43 }
 0x324   :  { %v4850_v46 = vpop.f32.mrb[32].mxu1  ;;  %v4838_v47 = vpop.f32.mrb[16].mxu0 }
 0x325   :  { %v1471_v48 = vpop.f32.mrb[33].mxu1  ;;  %v1383_v49 = vpop.f32.mrb[17].mxu0 }
 0x326   :  { %v4851_v50 = vpop.f32.mrb[34].mxu1  ;;  %v4839_v51 = vpop.f32.mrb[18].mxu0 }
 0x327   :  { %v1487_v52 = vpack.c.bf16 %v4851_v50, %v4850_v46  ;;  %v1474_v53 = vpop.f32.mrb[35].mxu1  ;;  %v1399_v54 = vpack.c.bf16 %v4839_v51, %v4838_v47  ;;  %v1386_v55 = vpop.f32.mrb[19].mxu0 }
 0x328   :  { %v1486_v56 = vpack.c.bf16 %v1474_v53, %v1471_v48  ;;  %v1398_v57 = vpack.c.bf16 %v1386_v55, %v1383_v49 }
 0x32a   :  { %4868 = vmatprep.mubr.bf16.mxu0 %v1486_v56 }
 0x32b   :  { %4869 = vmatmul.mubr.bf16.vlgmr.msra.gmra.mrb[20].mxu0 %v1487_v52 }
 0x32c   :  { %4873 = vmatpush3.bf16.msra.mxu0 %v5364_v45  ;;  %4888 = vmatprep.mubr.bf16.mxu0 %v1398_v57 }
 0x32d   :  { %4874 = vmatprep.subr.bf16.mxu0 %v5365_v58 }
 0x330   :  { %4875 = vmatpush3.bf16.msra.mxu0 %v5365_v58 }
 0x331   :  { %4876 = vmatprep.subr.bf16.mxu0 %v5366_v59 }
 0x334   :  { %4877 = vmatpush3.bf16.msra.mxu0 %v5366_v59  ;;  %v4902_v61 = vpop.f32.mrb[36].mxu1 }
 0x335   :  { %4878 = vmatprep.subr.bf16.mxu0 %v5367_v60  ;;  %v1754_v63 = vpop.f32.mrb[37].mxu1 }
 0x336   :  { %v4903_v0 = vpop.f32.mrb[38].mxu1 }
 0x337   :  { %v1770_v1 = vpack.c.bf16 %v4903_v0, %v4902_v61  ;;  %v1757_v2 = vpop.f32.mrb[39].mxu1  ;;  %v5397_v0 = vld [vmem:[%s6516_s8 + $0x8] sm:$0xff]  }
 0x338   :  { %4879 = vmatpush3.bf16.msra.mxu0 %v5367_v60  ;;  %v1769_v3 = vpack.c.bf16 %v1757_v2, %v1754_v63  ;;  %v5396_v63 = vld [vmem:[%s6516_s8] sm:$0xff]   ;;  %v5399_v2 = vld [vmem:[%s6517_s9 + $0x48] sm:$0xff]  }
 0x339   :  { %4880 = vmatprep.subr.bf16.mxu0 %v5368_v62 }
 0x33c   :  { %4881 = vmatpush3.bf16.msra.mxu0 %v5368_v62 }
 0x33d   :  { %4882 = vmatprep.subr.bf16.mxu0 %v5369_v4 }
 0x340   :  { %4883 = vmatpush3.bf16.msra.mxu0 %v5369_v4  ;;  %v5401_v4 = vld [vmem:[%s6517_s9 + $0x58] sm:$0xff]  }
 0x341   :  { %4884 = vmatprep.subr.bf16.mxu0 %v5370_v5 }
 0x344   :  { %4885 = vmatpush3.bf16.msra.mxu0 %v5370_v5  ;;  %v5995_v7 = vpop.f32.mrb[40].mxu1  ;;  %v5402_v5 = vld [vmem:[%s6517_s9 + $0x60] sm:$0xff]  }
 0x345   :  { %4886 = vmatprep.subr.bf16.mxu0 %v5371_v6  ;;  %v1944_v9 = vpop.f32.mrb[41].mxu1 }
 0x346   :  { %v6000_v10 = vpop.f32.mrb[42].mxu1 }
 0x347   :  { %v1960_v11 = vpack.c.bf16 %v6000_v10, %v5995_v7  ;;  %v1947_v12 = vpop.f32.mrb[43].mxu1  ;;  %v5404_v7 = vld [vmem:[%s6517_s9 + $0x70] sm:$0xff]  }
 0x348   :  { %4887 = vmatpush3.bf16.msra.mxu0 %v5371_v6  ;;  %v1959_v13 = vpack.c.bf16 %v1947_v12, %v1944_v9  ;;  %v5403_v6 = vld [vmem:[%s6517_s9 + $0x68] sm:$0xff]   ;;  %v5415_v9 = vld [vmem:[%s6516_s8 + $0x18] sm:$0xff]  }
 0x349   :  { %4904 = vmatprep.subr.bf16.mxu0 %v5372_v8 }
 0x34b   :  { %4889 = vmatmul.mubr.bf16.vlgmr.msra.gmra.mrb[20].mxu0 %v1399_v54 }
 0x34c   :  { %4905 = vmatpush3.bf16.msra.mxu0 %v5372_v8  ;;  %4920 = vmatprep.mubr.bf16.mxu0 %v1769_v3  ;;  %v5400_v3 = vld [vmem:[%s6517_s9 + $0x50] sm:$0xff]   ;;  %v5405_v8 = vld [vmem:[%s6517_s9 + $0x78] sm:$0xff]  }
 0x34d   :  { %4906 = vmatprep.subr.bf16.mxu0 %v5373_v14 }
 0x350   :  { %4907 = vmatpush3.bf16.msra.mxu0 %v5373_v14 }
 0x351   :  { %4908 = vmatprep.subr.bf16.mxu0 %v5374_v15 }
 0x354   :  { %4909 = vmatpush3.bf16.msra.mxu0 %v5374_v15  ;;  %v6013_v17 = vpop.f32.mrb[44].mxu1 }
 0x355   :  { %4910 = vmatprep.subr.bf16.mxu0 %v5375_v16  ;;  %v2134_v19 = vpop.f32.mrb[45].mxu1 }
 0x356   :  { %v6018_v20 = vpop.f32.mrb[46].mxu1 }
 0x357   :  { %v2150_v21 = vpack.c.bf16 %v6018_v20, %v6013_v17  ;;  %v2137_v22 = vpop.f32.mrb[47].mxu1 }
 0x358   :  { %4911 = vmatpush3.bf16.msra.mxu0 %v5375_v16  ;;  %v2149_v23 = vpack.c.bf16 %v2137_v22, %v2134_v19  ;;  %v5408_v22 = vld [vmem:[%s6517_s9 + $0x10] sm:$0xff]  }
 0x359   :  { %4912 = vmatprep.subr.bf16.mxu0 %v5376_v18 }
 0x35c   :  { %4913 = vmatpush3.bf16.msra.mxu0 %v5376_v18  ;;  %v5406_v18 = vld [vmem:[%s6517_s9] sm:$0xff]  }
 0x35d   :  { %4914 = vmatprep.subr.bf16.mxu0 %v5377_v24 }
 0x360   :  { %4915 = vmatpush3.bf16.msra.mxu0 %v5377_v24  ;;  %v5410_v24 = vld [vmem:[%s6517_s9 + $0x20] sm:$0xff]  }
 0x361   :  { %4916 = vmatprep.subr.bf16.mxu0 %v5378_v25 }
 0x364   :  { %4917 = vmatpush3.bf16.msra.mxu0 %v5378_v25  ;;  %v5411_v25 = vld [vmem:[%s6517_s9 + $0x28] sm:$0xff]  }
 0x365   :  { %4918 = vmatprep.subr.bf16.mxu0 %v5379_v26 }
 0x368   :  { %4919 = vmatpush3.bf16.msra.mxu0 %v5379_v26  ;;  %v5412_v26 = vld [vmem:[%s6517_s9 + $0x30] sm:$0xff]  }
 0x369   :  { %4936 = vmatprep.subr.bf16.mxu0 %v5380_v27 }
 0x36b   :  { %4921 = vmatmul.mubr.bf16.vlgmr.msra.gmra.mrb[20].mxu0 %v1770_v1  ;;  %v5398_v1 = vld [vmem:[%s6517_s9 + $0x40] sm:$0xff]  }
 0x36c   :  { %4937 = vmatpush3.bf16.msra.mxu0 %v5380_v27  ;;  %4952 = vmatprep.mubr.bf16.mxu0 %v1959_v13  ;;  %v5413_v27 = vld [vmem:[%s6517_s9 + $0x38] sm:$0xff]  }
 0x36d   :  { %4938 = vmatprep.subr.bf16.mxu0 %v5381_v28 }
 0x370   :  { %4939 = vmatpush3.bf16.msra.mxu0 %v5381_v28  ;;  %v5414_v28 = vld [vmem:[%s6516_s8 + $0x10] sm:$0xff]  }
 0x371   :  { %4940 = vmatprep.subr.bf16.mxu0 %v5382_v29 }
 0x374   :  { %4941 = vmatpush3.bf16.msra.mxu0 %v5382_v29  ;;  %v5416_v29 = vld [vmem:[%s6517_s9 + $0x80] sm:$0xff]  }
 0x375   :  { %4942 = vmatprep.subr.bf16.mxu0 %v5383_v30 }
 0x378   :  { %4943 = vmatpush3.bf16.msra.mxu0 %v5383_v30  ;;  %v5417_v30 = vld [vmem:[%s6517_s9 + $0xc0] sm:$0xff]  }
 0x379   :  { %4944 = vmatprep.subr.bf16.mxu0 %v5384_v31 }
 0x37c   :  { %4945 = vmatpush3.bf16.msra.mxu0 %v5384_v31  ;;  %v5418_v31 = vld [vmem:[%s6517_s9 + $0x88] sm:$0xff]  }
 0x37d   :  { %4946 = vmatprep.subr.bf16.mxu0 %v5385_v32 }
 0x380   :  { %4947 = vmatpush3.bf16.msra.mxu0 %v5385_v32  ;;  %v5419_v32 = vld [vmem:[%s6517_s9 + $0xc8] sm:$0xff]  }
 0x381   :  { %4948 = vmatprep.subr.bf16.mxu0 %v5386_v33 }
 0x384   :  { %4949 = vmatpush3.bf16.msra.mxu0 %v5386_v33  ;;  %v5420_v33 = vld [vmem:[%s6517_s9 + $0x90] sm:$0xff]  }
 0x385   :  { %4950 = vmatprep.subr.bf16.mxu0 %v5387_v34 }
 0x388   :  { %4951 = vmatpush3.bf16.msra.mxu0 %v5387_v34  ;;  %v5421_v34 = vld [vmem:[%s6517_s9 + $0xd0] sm:$0xff]  }
 0x389   :  { %4968 = vmatprep.subr.bf16.mxu0 %v5388_v35 }
 0x38b   :  { %4953 = vmatmul.mubr.bf16.vlgmr.msra.gmra.mrb[20].mxu0 %v1960_v11 }
 0x38c   :  { %4969 = vmatpush3.bf16.msra.mxu0 %v5388_v35  ;;  %4984 = vmatprep.mubr.bf16.mxu0 %v2149_v23  ;;  %v5409_v23 = vld [vmem:[%s6517_s9 + $0x18] sm:$0xff]  }
 0x38d   :  { %4970 = vmatprep.subr.bf16.mxu0 %v5389_v36  ;;  %v5422_v35 = vld [vmem:[%s6517_s9 + $0x98] sm:$0xff]  }
 0x390   :  { %4971 = vmatpush3.bf16.msra.mxu0 %v5389_v36  ;;  %v5423_v36 = vld [vmem:[%s6517_s9 + $0xd8] sm:$0xff]  }
 0x391   :  { %4972 = vmatprep.subr.bf16.mxu0 %v5390_v37 }
 0x394   :  { %4973 = vmatpush3.bf16.msra.mxu0 %v5390_v37  ;;  %v5424_v37 = vld [vmem:[%s6517_s9 + $0xa0] sm:$0xff]  }
 0x395   :  { %4974 = vmatprep.subr.bf16.mxu0 %v5391_v38 }
 0x398   :  { %4975 = vmatpush3.bf16.msra.mxu0 %v5391_v38  ;;  %v5425_v38 = vld [vmem:[%s6517_s9 + $0xe0] sm:$0xff]  }
 0x399   :  { %4976 = vmatprep.subr.bf16.mxu0 %v5392_v39 }
 0x39c   :  { %4977 = vmatpush3.bf16.msra.mxu0 %v5392_v39  ;;  %v5426_v39 = vld [vmem:[%s6517_s9 + $0xa8] sm:$0xff]  }
 0x39d   :  { %4978 = vmatprep.subr.bf16.mxu0 %v5393_v40 }
 0x3a0   :  { %4979 = vmatpush3.bf16.msra.mxu0 %v5393_v40  ;;  %v5427_v40 = vld [vmem:[%s6517_s9 + $0xe8] sm:$0xff]  }
 0x3a1   :  { %4980 = vmatprep.subr.bf16.mxu0 %v5394_v41 }
 0x3a4   :  { %4981 = vmatpush3.bf16.msra.mxu0 %v5394_v41  ;;  %v5428_v41 = vld [vmem:[%s6517_s9 + $0xb0] sm:$0xff]  }
 0x3a5   :  { %4982 = vmatprep.subr.bf16.mxu0 %v5395_v42 }
 0x3a8   :  { %4983 = vmatpush3.bf16.msra.mxu0 %v5395_v42  ;;  %v5429_v42 = vld [vmem:[%s6517_s9 + $0xf0] sm:$0xff]  }
 0x3a9   :  { %5072 = vmatprep.subr.bf16.mxu0 %v5474_v43 }
 0x3ab   :  { %4985 = vmatmul.mubr.bf16.vlgmr.msra.gmra.mrb[20].mxu0 %v2150_v21  ;;  %v5407_v21 = vld [vmem:[%s6517_s9 + $0x8] sm:$0xff]  }
 0x3ac   :  { %5076 = vmatprep.mubr.msk.bf16.mxu0 %vm5475_vm10, %v5474_v43 }
 0x47e   :  { %v4986_v45 = vpop.f32.mrb[20].mxu0 }
 0x47f   :  { %v2278_v46 = vadd.f32 %v4986_v45, %v4098_v44  ;;  %v2250_v47 = vpop.f32.mrb[21].mxu0 }
 0x480   :  { %v2276_v48 = vadd.f32 %v4098_v44, %v2250_v47  ;;  %v4987_v49 = vpop.f32.mrb[22].mxu0 }
 0x481   :  { %v2286_v50 = vmul.f32 0.01, %v2278_v46  ;;  %v2279_v51 = vadd.f32 %v4987_v49, %v4098_v44  ;;  %v2253_v52 = vpop.f32.mrb[23].mxu0  ;;  %vm2282_vm11 = vcmp.gt.f32.partialorder %v2278_v46, 0.0 }
 0x482   :  { %v2284_v53 = vmul.f32 0.01, %v2276_v48  ;;  %v2277_v54 = vadd.f32 %v4098_v44, %v2253_v52  ;;  %vm2280_vm12 = vcmp.gt.f32.partialorder %v2276_v48, 0.0  ;;  %v5430_v44 = vld [vmem:[%s6517_s9 + $0xb8] sm:$0xff]  }
 0x483   :  { %vm2283_vm13 = vcmp.gt.f32.partialorder %v2279_v51, 0.0  ;;  %v2287_v55 = vmul.f32 0.01, %v2279_v51  ;;  %v2290_v57 = vsel %vm2282_vm11, %v2278_v46, %v2286_v50  ;;  %v5431_v46 = vld [vmem:[%s6517_s9 + $0xf8] sm:$0xff]  }
 0x484   :  { %vm2281_vm14 = vcmp.gt.f32.partialorder %v2277_v54, 0.0  ;;  %v2285_v56 = vmul.f32 0.01, %v2277_v54  ;;  %v2288_v59 = vsel %vm2280_vm12, %v2276_v48, %v2284_v53 }
 0x485   :  { %v2291_v58 = vsel %vm2283_vm13, %v2279_v51, %v2287_v55 }
 0x486   :  { %v6094_v60 = vpack.c.bf16 %v2291_v58, %v2290_v57  ;;  %v2289_v61 = vsel %vm2281_vm14, %v2277_v54, %v2285_v56 }
 0x487   :  { %v6096_v62 = vpack.c.bf16 %v2289_v61, %v2288_v59 }
 0x489   :  { %4989 = vmatpush3.bf16.msra.mxu1 %v6096_v62  ;;  %5073 = vmatpush3.bf16.msra.mxu0 %v6096_v62 }
 0x48a   :  { %4990 = vmatprep.subr.bf16.mxu1 %v5474_v43  ;;  %5074 = vmatprep.subr.bf16.mxu0 %v5474_v43 }
 0x48d   :  { %4991 = vmatpush3.bf16.msra.mxu1 %v6094_v60  ;;  %5075 = vmatpush3.bf16.msra.mxu0 %v6094_v60 }
 0x48e   :  { %4996 = vmatprep.subr.bf16.mxu1 %v5474_v43  ;;  %5080 = vmatprep.subr.bf16.mxu0 %v5474_v43 }
 0x490   :  { %4993 = vmatmul.mubr.msk.bf16.vlgmr.msra.gmra.mrb[48].mxu1 %vm2301_vm15, %v5396_v63  ;;  %5077 = vmatmul.mubr.msk.bf16.vlgmr.msra.gmra.mrb[24].mxu0 %vm2301_vm15, %v5415_v9 }
 0x491   :  { %4997 = vmatpush3.bf16.msra.mxu1 %v6096_v62  ;;  %5000 = vmatprep.mubr.msk.bf16.mxu1 %vm5475_vm10, %v5474_v43 }
 0x492   :  { %4998 = vmatprep.subr.bf16.mxu1 %v5474_v43  ;;  %5096 = vmatprep.mubr.msk.bf16.mxu0 %vm5475_vm10, %v5474_v43 }
 0x493   :  { %5081 = vmatpush3.bf16.msra.mxu0 %v5417_v30 }
 0x494   :  { %5082 = vmatprep.subr.bf16.mxu0 %v5474_v43 }
 0x495   :  { %4999 = vmatpush3.bf16.msra.mxu1 %v6094_v60 }
 0x496   :  { %5004 = vmatprep.subr.bf16.mxu1 %v5474_v43 }
 0x497   :  { %5083 = vmatpush3.bf16.msra.mxu0 %v5419_v32 }
 0x498   :  { %5001 = vmatmul.mubr.msk.bf16.vlgmr.msra.gmra.mrb[52].mxu1 %vm2301_vm15, %v5397_v0  ;;  %5084 = vmatprep.subr.bf16.mxu0 %v5474_v43 }
 0x499   :  { %5005 = vmatpush3.bf16.msra.mxu1 %v5398_v1  ;;  %5020 = vmatprep.mubr.msk.bf16.mxu1 %vm5475_vm10, %v5474_v43 }
 0x49a   :  { %5006 = vmatprep.subr.bf16.mxu1 %v5474_v43 }
 0x49b   :  { %5085 = vmatpush3.bf16.msra.mxu0 %v5421_v34 }
 0x49c   :  { %5086 = vmatprep.subr.bf16.mxu0 %v5474_v43 }
 0x49d   :  { %5007 = vmatpush3.bf16.msra.mxu1 %v5399_v2 }
 0x49e   :  { %5008 = vmatprep.subr.bf16.mxu1 %v5474_v43 }
 0x49f   :  { %5087 = vmatpush3.bf16.msra.mxu0 %v5423_v36 }
 0x4a0   :  { %5088 = vmatprep.subr.bf16.mxu0 %v5474_v43 }
 0x4a1   :  { %5009 = vmatpush3.bf16.msra.mxu1 %v5400_v3 }
 0x4a2   :  { %5010 = vmatprep.subr.bf16.mxu1 %v5474_v43 }
 0x4a3   :  { %5089 = vmatpush3.bf16.msra.mxu0 %v5425_v38 }
 0x4a4   :  { %5090 = vmatprep.subr.bf16.mxu0 %v5474_v43 }
 0x4a5   :  { %5011 = vmatpush3.bf16.msra.mxu1 %v5401_v4  ;;  %v5432_v4 = vld [vmem:[%s6516_s8 + $0x20] sm:$0xff]  }
 0x4a6   :  { %5012 = vmatprep.subr.bf16.mxu1 %v5474_v43 }
 0x4a7   :  { %5091 = vmatpush3.bf16.msra.mxu0 %v5427_v40 }
 0x4a8   :  { %5092 = vmatprep.subr.bf16.mxu0 %v5474_v43 }
 0x4a9   :  { %5013 = vmatpush3.bf16.msra.mxu1 %v5402_v5  ;;  %v5433_v5 = vld [vmem:[%s6517_s9 + $0x100] sm:$0xff]  }
 0x4aa   :  { %5014 = vmatprep.subr.bf16.mxu1 %v5474_v43 }
 0x4ab   :  { %5093 = vmatpush3.bf16.msra.mxu0 %v5429_v42 }
 0x4ac   :  { %5094 = vmatprep.subr.bf16.mxu0 %v5474_v43 }
 0x4ad   :  { %5015 = vmatpush3.bf16.msra.mxu1 %v5403_v6  ;;  %v5436_v6 = vld [vmem:[%s6517_s9 + $0x118] sm:$0xff]  }
 0x4ae   :  { %5016 = vmatprep.subr.bf16.mxu1 %v5474_v43 }
 0x4af   :  { %5095 = vmatpush3.bf16.msra.mxu0 %v5431_v46  ;;  %v4233_v46 = vld [vmem:[%s6523_s11 + $0x2] sm:$0x3] }
 0x4b0   :  { %5128 = vmatprep.subr.bf16.mxu0 %v5474_v43 }
 0x4b1   :  { %5017 = vmatpush3.bf16.msra.mxu1 %v5404_v7  ;;  %v5437_v7 = vld [vmem:[%s6517_s9 + $0x120] sm:$0xff]  }
 0x4b2   :  { %5018 = vmatprep.subr.bf16.mxu1 %v5474_v43 }
 0x4b5   :  { %5019 = vmatpush3.bf16.msra.mxu1 %v5405_v8  ;;  %v5438_v8 = vld [vmem:[%s6517_s9 + $0x128] sm:$0xff]  }
 0x4b6   :  { %5024 = vmatprep.subr.bf16.mxu1 %v5474_v43 }
 0x563   :  { %v2339_v10 = vpop.f32.mrb[48].mxu1  ;;  %v2817_v45 = vpop.f32.mrb[24].mxu0 }
 0x564   :  { %v4994_v11 = vpop.f32.mrb[49].mxu1  ;;  %v5078_v47 = vpop.f32.mrb[25].mxu0 }
 0x565   :  { %v2342_v12 = vpop.f32.mrb[50].mxu1  ;;  %v2820_v48 = vpop.f32.mrb[26].mxu0  ;;  %v5442_v47 = vld [vmem:[%s6521_s12] sm:$0xff]  }
 0x566   :  { %v2346_v13 = vpack.c.bf16 %v2342_v12, %v2339_v10  ;;  %v4995_v14 = vpop.f32.mrb[51].mxu1  ;;  %v2824_v49 = vpack.c.bf16 %v2820_v48, %v2817_v45  ;;  %v5079_v50 = vpop.f32.mrb[27].mxu0  ;;  %v5439_v12 = vld [vmem:[%s6517_s9 + $0x130] sm:$0xff]   ;;  %v3113_v45 = vld [vmem:[%s6523_s11] sm:$0x3] }
 0x567   :  { %v5440_v14 = vld [vmem:[%s6517_s9 + $0x138] sm:$0xff]   ;;  %v5443_v48 = vld [vmem:[%s6521_s12 + $0x40] sm:$0xff]   ;;  %v5445_v50 = vld [vmem:[%s6521_s12 + $0x48] sm:$0xff]  }
 0x568   :  { %5097 = vmatmul.mubr.bf16.vlgmr.msra.gmra.mrb[28].mxu0 %v2824_v49  ;;  %v5444_v49 = vld [vmem:[%s6521_s12 + $0x8] sm:$0xff]  }
 0x569   :  { %5130 = vmatprep.mubr.msk.bf16.mxu0 %vm5475_vm10, %v5474_v43 }
 0x56b   :  { %v2408_v15 = vpop.f32.mrb[52].mxu1 }
 0x56c   :  { %v5002_v16 = vpop.f32.mrb[53].mxu1 }
 0x56d   :  { %v2411_v17 = vpop.f32.mrb[54].mxu1 }
 0x56e   :  { %v2415_v19 = vpack.c.bf16 %v2411_v17, %v2408_v15  ;;  %v5003_v20 = vpop.f32.mrb[55].mxu1 }
 0x570   :  { %5021 = vmatmul.mubr.bf16.vlgmr.msra.gmra.mrb[56].mxu1 %v2415_v19 }
 0x571   :  { %5025 = vmatpush3.bf16.msra.mxu1 %v5406_v18  ;;  %5040 = vmatprep.mubr.msk.bf16.mxu1 %vm5475_vm10, %v5474_v43 }
 0x572   :  { %5026 = vmatprep.subr.bf16.mxu1 %v5474_v43 }
 0x575   :  { %5027 = vmatpush3.bf16.msra.mxu1 %v5407_v21 }
 0x576   :  { %5028 = vmatprep.subr.bf16.mxu1 %v5474_v43 }
 0x579   :  { %5029 = vmatpush3.bf16.msra.mxu1 %v5408_v22 }
 0x57a   :  { %5030 = vmatprep.subr.bf16.mxu1 %v5474_v43 }
 0x57d   :  { %5031 = vmatpush3.bf16.msra.mxu1 %v5409_v23 }
 0x57e   :  { %5032 = vmatprep.subr.bf16.mxu1 %v5474_v43 }
 0x581   :  { %5033 = vmatpush3.bf16.msra.mxu1 %v5410_v24 }
 0x582   :  { %5034 = vmatprep.subr.bf16.mxu1 %v5474_v43 }
 0x585   :  { %5035 = vmatpush3.bf16.msra.mxu1 %v5411_v25 }
 0x586   :  { %5036 = vmatprep.subr.bf16.mxu1 %v5474_v43 }
 0x589   :  { %5037 = vmatpush3.bf16.msra.mxu1 %v5412_v26 }
 0x58a   :  { %5038 = vmatprep.subr.bf16.mxu1 %v5474_v43 }
 0x58d   :  { %5039 = vmatpush3.bf16.msra.mxu1 %v5413_v27 }
 0x58e   :  { %5044 = vmatprep.subr.bf16.mxu1 %v5474_v43 }
 0x590   :  { %5041 = vmatmul.mubr.bf16.vlgmr.msra.gmra.mrb[60].mxu1 %v2346_v13 }
 0x591   :  { %5045 = vmatpush3.bf16.msra.mxu1 %v6096_v62  ;;  %5048 = vmatprep.mubr.msk.bf16.mxu1 %vm5475_vm10, %v5474_v43 }
 0x592   :  { %5046 = vmatprep.subr.bf16.mxu1 %v5474_v43 }
 0x595   :  { %5047 = vmatpush3.bf16.msra.mxu1 %v6094_v60 }
 0x596   :  { %5052 = vmatprep.subr.bf16.mxu1 %v5474_v43 }
 0x598   :  { %5049 = vmatmul.mubr.msk.bf16.vlgmr.msra.gmra.mrb[64].mxu1 %vm2301_vm15, %v5414_v28  ;;  %v5441_v28 = vld [vmem:[%s6519_s13] sm:$0xff]  }
 0x599   :  { %5068 = vmatprep.mubr.msk.bf16.mxu1 %vm5475_vm10, %v5474_v43  ;;  %5053 = vmatpush3.bf16.msra.mxu1 %v5416_v29  ;;  %v3110_v29 = vld [vmem:[%s6520_s1] sm:$0x3] }
 0x59a   :  { %5054 = vmatprep.subr.bf16.mxu1 %v5474_v43 }
 0x59d   :  { %5055 = vmatpush3.bf16.msra.mxu1 %v5418_v31  ;;  %v4221_v31 = vld [vmem:[%s6522_s10] ss:$0 sm:$0xff] }
 0x59e   :  { %5056 = vmatprep.subr.bf16.mxu1 %v5474_v43 }
 0x5a1   :  { %5057 = vmatpush3.bf16.msra.mxu1 %v5420_v33 }
 0x5a2   :  { %5058 = vmatprep.subr.bf16.mxu1 %v5474_v43 }
 0x5a5   :  { %5059 = vmatpush3.bf16.msra.mxu1 %v5422_v35 }
 0x5a6   :  { %5060 = vmatprep.subr.bf16.mxu1 %v5474_v43 }
 0x5a9   :  { %5061 = vmatpush3.bf16.msra.mxu1 %v5424_v37 }
 0x5aa   :  { %5062 = vmatprep.subr.bf16.mxu1 %v5474_v43 }
 0x5ad   :  { %5063 = vmatpush3.bf16.msra.mxu1 %v5426_v39 }
 0x5ae   :  { %5064 = vmatprep.subr.bf16.mxu1 %v5474_v43 }
 0x5b1   :  { %5065 = vmatpush3.bf16.msra.mxu1 %v5428_v41 }
 0x5b2   :  { %5066 = vmatprep.subr.bf16.mxu1 %v5474_v43 }
 0x5b5   :  { %5067 = vmatpush3.bf16.msra.mxu1 %v5430_v44 }
 0x5b6   :  { %5100 = vmatprep.subr.bf16.mxu1 %v5474_v43 }
 0x63b   :  { %v2924_v9 = vpop.f32.mrb[28].mxu0 }
 0x63c   :  { %v5098_v10 = vpop.f32.mrb[29].mxu0 }
 0x63d   :  { %v2927_v11 = vpop.f32.mrb[30].mxu0 }
 0x63e   :  { %v5099_v13 = vpop.f32.mrb[31].mxu0 }
 0x63f   :  { %v4259_v13 = vld [vmem:[%s6523_s11 + $0x4] sm:$0x3] }
 0x643   :  { %v2515_v51 = vpop.f32.mrb[56].mxu1 }
 0x644   :  { %v5022_v52 = vpop.f32.mrb[57].mxu1 }
 0x645   :  { %v2518_v53 = vpop.f32.mrb[58].mxu1  ;;  %v5447_v52 = vld [vmem:[%s6521_s12 + $0x50] sm:$0xff]  }
 0x646   :  { %v5023_v54 = vpop.f32.mrb[59].mxu1 }
 0x647   :  { %v5449_v54 = vld [vmem:[%s6521_s12 + $0x58] sm:$0xff]  }
 0x663   :  { %v2604_v55 = vpop.f32.mrb[60].mxu1 }
 0x664   :  { %v2605_v56 = vadd.f32 %v2604_v55, %v2515_v51  ;;  %v5042_v57 = vpop.f32.mrb[61].mxu1  ;;  %v5446_v51 = vld [vmem:[%s6521_s12 + $0x10] sm:$0xff]   ;;  %v5450_v55 = vld [vmem:[%s6521_s12 + $0x20] sm:$0xff]  }
 0x665   :  { %v2607_v58 = vpop.f32.mrb[62].mxu1  ;;  %v5452_v57 = vld [vmem:[%s6521_s12 + $0x28] sm:$0xff]  }
 0x666   :  { %v2608_v59 = vadd.f32 %v2607_v58, %v2518_v53  ;;  %v5043_v61 = vpop.f32.mrb[63].mxu1  ;;  %v5448_v53 = vld [vmem:[%s6521_s12 + $0x18] sm:$0xff]   ;;  %v5453_v58 = vld [vmem:[%s6521_s12 + $0x68] sm:$0xff]  }
 0x667   :  { %v5455_v61 = vld [vmem:[%s6521_s12 + $0x70] sm:$0xff]  }
 0x66b   :  { %v2656_v63 = vpop.f32.mrb[64].mxu1 }
 0x66c   :  { %v5050_v0 = vpop.f32.mrb[65].mxu1 }
 0x66d   :  { %v2659_v1 = vpop.f32.mrb[66].mxu1  ;;  %v5457_v0 = vld [vmem:[%s6521_s12 + $0x78] sm:$0xff]  }
 0x66e   :  { %v2663_v2 = vpack.c.bf16 %v2659_v1, %v2656_v63  ;;  %v5051_v3 = vpop.f32.mrb[67].mxu1  ;;  %v5456_v63 = vld [vmem:[%s6521_s12 + $0x38] sm:$0xff]  }
 0x670   :  { %5069 = vmatmul.mubr.bf16.vlgmr.msra.gmra.mrb[68].mxu1 %v2663_v2 }
 0x671   :  { %5101 = vmatpush3.bf16.msra.mxu1 %v6096_v62  ;;  %5104 = vmatprep.mubr.msk.bf16.mxu1 %vm5475_vm10, %v5474_v43  ;;  %v5434_v62 = vld [vmem:[%s6517_s9 + $0x108] sm:$0xff]  }
 0x672   :  { %5102 = vmatprep.subr.bf16.mxu1 %v5474_v43 }
 0x675   :  { %5103 = vmatpush3.bf16.msra.mxu1 %v6094_v60  ;;  %v5435_v60 = vld [vmem:[%s6517_s9 + $0x110] sm:$0xff]  }
 0x676   :  { %5108 = vmatprep.subr.bf16.mxu1 %v5474_v43 }
 0x678   :  { %5105 = vmatmul.mubr.msk.bf16.vlgmr.msra.gmra.mrb[72].mxu1 %vm2301_vm15, %v5432_v4 }
 0x679   :  { %5109 = vmatpush3.bf16.msra.mxu1 %v5433_v5  ;;  %5124 = vmatprep.mubr.msk.bf16.mxu1 %vm5475_vm10, %v5474_v43 }
 0x67a   :  { %5110 = vmatprep.subr.bf16.mxu1 %v5474_v43 }
 0x67d   :  { %5111 = vmatpush3.bf16.msra.mxu1 %v5434_v62 }
 0x67e   :  { %5112 = vmatprep.subr.bf16.mxu1 %v5474_v43 }
 0x681   :  { %5113 = vmatpush3.bf16.msra.mxu1 %v5435_v60 }
 0x682   :  { %5114 = vmatprep.subr.bf16.mxu1 %v5474_v43 }
 0x685   :  { %5115 = vmatpush3.bf16.msra.mxu1 %v5436_v6 }
 0x686   :  { %5116 = vmatprep.subr.bf16.mxu1 %v5474_v43 }
 0x689   :  { %5117 = vmatpush3.bf16.msra.mxu1 %v5437_v7 }
 0x68a   :  { %5118 = vmatprep.subr.bf16.mxu1 %v5474_v43 }
 0x68d   :  { %5119 = vmatpush3.bf16.msra.mxu1 %v5438_v8 }
 0x68e   :  { %5120 = vmatprep.subr.bf16.mxu1 %v5474_v43 }
 0x691   :  { %5121 = vmatpush3.bf16.msra.mxu1 %v5439_v12 }
 0x692   :  { %5122 = vmatprep.subr.bf16.mxu1 %v5474_v43 }
 0x695   :  { %5123 = vmatpush3.bf16.msra.mxu1 %v5440_v14  ;;  %v4285_v14 = vld [vmem:[%s6523_s11 + $0x6] sm:$0x3] }
 0x696   :  { %5154 = vmatprep.subr.bf16.mxu1 %v5474_v43 }
 0x743   :  { %v2763_v15 = vpop.f32.mrb[68].mxu1 }
 0x744   :  { %v2770_v16 = vadd.f32 %v2763_v15, %v2605_v56  ;;  %v5070_v17 = vpop.f32.mrb[69].mxu1  ;;  %v5451_v56 = vld [vmem:[%s6521_s12 + $0x60] sm:$0xff]  }
 0x745   :  { %v2766_v18 = vpop.f32.mrb[70].mxu1  ;;  %v5458_v15 = vld [vmem:[%s6521_s12 + $0x80] sm:$0xff]   ;;  %v5460_v17 = vld [vmem:[%s6521_s12 + $0x88] sm:$0xff]  }
 0x746   :  { %v2771_v19 = vadd.f32 %v2766_v18, %v2608_v59  ;;  %v2931_v20 = vadd.f32 %v2924_v9, %v2770_v16  ;;  %v5071_v21 = vpop.f32.mrb[71].mxu1  ;;  %v5454_v59 = vld [vmem:[%s6521_s12 + $0x30] sm:$0xff]   ;;  %v5459_v16 = vld [vmem:[%s6521_s12 + $0xc0] sm:$0xff]   ;;  %v5461_v18 = vld [vmem:[%s6521_s12 + $0xc8] sm:$0xff]  }
 0x747   :  { %v5464_v21 = vld [vmem:[%s6521_s12 + $0x98] sm:$0xff]  }
 0x748   :  { %v2932_v22 = vadd.f32 %v2927_v11, %v2771_v19  ;;  %v5462_v19 = vld [vmem:[%s6521_s12 + $0x90] sm:$0xff]  }
 0x74b   :  { %v2978_v23 = vpop.f32.mrb[72].mxu1 }
 0x74c   :  { %v5106_v24 = vpop.f32.mrb[73].mxu1 }
 0x74d   :  { %v2981_v25 = vpop.f32.mrb[74].mxu1  ;;  %v5467_v24 = vld [vmem:[%s6521_s12 + $0xe0] sm:$0xff]  }
 0x74e   :  { %v2985_v26 = vpack.c.bf16 %v2981_v25, %v2978_v23  ;;  %v5107_v27 = vpop.f32.mrb[75].mxu1  ;;  %v5466_v23 = vld [vmem:[%s6521_s12 + $0xa0] sm:$0xff]   ;;  %v5468_v25 = vld [vmem:[%s6521_s12 + $0xa8] sm:$0xff]  }
 0x74f   :  { %v5470_v27 = vld [vmem:[%s6521_s12 + $0xb0] sm:$0xff]  }
 0x750   :  { %5125 = vmatmul.mubr.bf16.vlgmr.msra.gmra.mrb[76].mxu1 %v2985_v26  ;;  %v5469_v26 = vld [vmem:[%s6521_s12 + $0xe8] sm:$0xff]  }
 0x751   :  { %5156 = vmatprep.mubr.msk.bf16.mxu1 %vm5475_vm10, %v5474_v43  ;;  %5155 = vmatpush3.bf16.msra.mxu1 %v5441_v28  ;;  %v5471_v28 = vld [vmem:[%s6521_s12 + $0xf0] sm:$0xff]  }
 0x752   :  { %5160 = vmatprep.subr.bf16.mxu1 %v5474_v43 }
 0x758   :  { %5157 = vmatmul.mubr.msk.bf16.vlgmr.msra.gmra.mrb[80].mxu1 %vm3114_vm0, %v3110_v29  ;;  %v5472_v29 = vld [vmem:[%s6521_s12 + $0xb8] sm:$0xff]  }
 0x759   :  { %5162 = vmatprep.mubr.msk.bf16.mxu1 %vm5475_vm10, %v5474_v43 }
 0x823   :  { %v3085_v30 = vpop.f32.mrb[76].mxu1 }
 0x824   :  { %v3092_v32 = vadd.f32 %v3085_v30, %v2931_v20  ;;  %v5126_v33 = vpop.f32.mrb[77].mxu1  ;;  %v5463_v20 = vld [vmem:[%s6521_s12 + $0xd0] sm:$0xff]   ;;  %v5473_v30 = vld [vmem:[%s6521_s12 + $0xf8] sm:$0xff]  }
 0x825   :  { %v3088_v34 = vpop.f32.mrb[78].mxu1 }
 0x826   :  { %v3101_v35 = vadd.f32 %v4221_v31, %v3092_v32  ;;  %v3093_v36 = vadd.f32 %v3088_v34, %v2932_v22  ;;  %v5127_v37 = vpop.f32.mrb[79].mxu1  ;;  %v5465_v22 = vld [vmem:[%s6521_s12 + $0xd8] sm:$0xff]  }
 0x828   :  { %v3105_v38 = vmul.f32 0.01, %v3101_v35  ;;  %v3102_v39 = vadd.f32 %v4221_v31, %v3093_v36  ;;  %vm3103_vm1 = vcmp.gt.f32.partialorder %v3101_v35, 0.0 }
 0x82a   :  { %vm3104_vm2 = vcmp.gt.f32.partialorder %v3102_v39, 0.0  ;;  %v3106_v40 = vmul.f32 0.01, %v3102_v39  ;;  %v3107_v41 = vsel %vm3103_vm1, %v3101_v35, %v3105_v38 }
 0x82b   :  { %v6413_v1 = vpop.f32.mrb[80].mxu1 }
 0x82c   :  { %v3108_v42 = vsel %vm3104_vm2, %v3102_v39, %v3106_v40  ;;  %v5158_v2 = vpop.f32.mrb[81].mxu1 }
 0x82d   :  { %v6331_v44 = vpack.c.bf16 %v3108_v42, %v3107_v41  ;;  %v3309_v3 = vpop.f32.mrb[82].mxu1 }
 0x82e   :  { %v5159_v4 = vpop.f32.mrb[83].mxu1 }
 0x82f   :  { %5129 = vmatpush3.bf16.msra.mxu0 %v6331_v44  ;;  %5161 = vmatpush3.bf16.msra.mxu1 %v6331_v44 }
 0x830   :  { %5134 = vmatprep.subr.bf16.mxu0 %v5474_v43  ;;  %5166 = vmatprep.subr.bf16.mxu1 %v5474_v43 }
 0x832   :  { %5131 = vmatmul.mubr.msk.bf16.vlgmr.msra.gmra.mrb[32].mxu0 %vm3114_vm0, %v3113_v45  ;;  %5163 = vmatmul.mubr.msk.bf16.vlgmr.msra.gmra.mrb[84].mxu1 %vm3114_vm0, %v4233_v46 }
 0x833   :  { %5135 = vmatpush3.bf16.msra.mxu0 %v5442_v47  ;;  %5167 = vmatpush3.bf16.msra.mxu1 %v5443_v48 }
 0x834   :  { %5136 = vmatprep.subr.bf16.mxu0 %v5474_v43  ;;  %5168 = vmatprep.subr.bf16.mxu1 %v5474_v43 }
 0x835   :  { %5150 = vmatprep.mubr.msk.bf16.mxu0 %vm5475_vm10, %v5474_v43  ;;  %5182 = vmatprep.mubr.msk.bf16.mxu1 %vm5475_vm10, %v5474_v43 }
 0x837   :  { %5137 = vmatpush3.bf16.msra.mxu0 %v5444_v49  ;;  %5169 = vmatpush3.bf16.msra.mxu1 %v5445_v50 }
 0x838   :  { %5138 = vmatprep.subr.bf16.mxu0 %v5474_v43  ;;  %5170 = vmatprep.subr.bf16.mxu1 %v5474_v43 }
 0x83b   :  { %5139 = vmatpush3.bf16.msra.mxu0 %v5446_v51  ;;  %5171 = vmatpush3.bf16.msra.mxu1 %v5447_v52  ;;  %v3781_v51 = vlaneseq }
 0x83c   :  { %5140 = vmatprep.subr.bf16.mxu0 %v5474_v43  ;;  %5172 = vmatprep.subr.bf16.mxu1 %v5474_v43 }
 0x83d   :  { %v3782_v52 = vshrl.u32 %v3781_v51, 7 }
 0x83f   :  { %5141 = vmatpush3.bf16.msra.mxu0 %v5448_v53  ;;  %5173 = vmatpush3.bf16.msra.mxu1 %v5449_v54  ;;  %v3779_v53 = vld [vmem:[%s6524_s15] sm:$0x1] }
 0x840   :  { %5142 = vmatprep.subr.bf16.mxu0 %v5474_v43  ;;  %5174 = vmatprep.subr.bf16.mxu1 %v5474_v43 }
 0x843   :  { %5143 = vmatpush3.bf16.msra.mxu0 %v5450_v55  ;;  %5175 = vmatpush3.bf16.msra.mxu1 %v5451_v56 }
 0x844   :  { %5144 = vmatprep.subr.bf16.mxu0 %v5474_v43  ;;  %5176 = vmatprep.subr.bf16.mxu1 %v5474_v43 }
 0x847   :  { %5145 = vmatpush3.bf16.msra.mxu0 %v5452_v57  ;;  %5177 = vmatpush3.bf16.msra.mxu1 %v5453_v58 }
 0x848   :  { %5146 = vmatprep.subr.bf16.mxu0 %v5474_v43  ;;  %5178 = vmatprep.subr.bf16.mxu1 %v5474_v43 }
 0x84b   :  { %5147 = vmatpush3.bf16.msra.mxu0 %v5454_v59  ;;  %5179 = vmatpush3.bf16.msra.mxu1 %v5455_v61  ;;  %v4311_v59 = vld [vmem:[%s6525_s14] ss:$0 sm:$0xff] }
 0x84c   :  { %5148 = vmatprep.subr.bf16.mxu0 %v5474_v43  ;;  %5180 = vmatprep.subr.bf16.mxu1 %v5474_v43 }
 0x84f   :  { %5149 = vmatpush3.bf16.msra.mxu0 %v5456_v63  ;;  %5181 = vmatpush3.bf16.msra.mxu1 %v5457_v0  ;;  %v3780_v0 = vunpack.c.l.bf16 %v3779_v53 }
 0x850   :  { %5186 = vmatprep.subr.bf16.mxu0 %v5474_v43  ;;  %5212 = vmatprep.subr.bf16.mxu1 %v5474_v43 }
 0x905   :  { %v3152_v5 = vpop.f32.mrb[32].mxu0  ;;  %v3351_v62 = vpop.f32.mrb[84].mxu1 }
 0x906   :  { %v3158_v60 = vpack.c.bf16 %v3152_v5, %v3152_v5  ;;  %v3357_v6 = vpack.c.bf16 %v3351_v62, %v3351_v62  ;;  %v5132_v7 = vpop.f32.mrb[33].mxu0  ;;  %v5164_v8 = vpop.f32.mrb[85].mxu1 }
 0x907   :  { %v3155_v9 = vpop.f32.mrb[34].mxu0  ;;  %v3354_v10 = vpop.f32.mrb[86].mxu1 }
 0x908   :  { %5151 = vmatmul.mubr.bf16.vlgmr.msra.gmra.mrb[36].mxu0 %v3158_v60  ;;  %5183 = vmatmul.mubr.bf16.vlgmr.msra.gmra.mrb[88].mxu1 %v3357_v6  ;;  %v5133_v11 = vpop.f32.mrb[35].mxu0  ;;  %v5165_v12 = vpop.f32.mrb[87].mxu1  ;;  %v3791_v9 = vstv %s6526_s16 }
 0x909   :  { %5187 = vmatpush3.bf16.msra.mxu0 %v6331_v44  ;;  %5213 = vmatpush3.bf16.msra.mxu1 %v6331_v44 }
 0x90a   :  { %5188 = vmatprep.mubr.msk.bf16.mxu0 %vm5475_vm10, %v5474_v43  ;;  %5214 = vmatprep.mubr.msk.bf16.mxu1 %vm5475_vm10, %v5474_v43 }
 0x90b   :  { %5192 = vmatprep.subr.bf16.mxu0 %v5474_v43  ;;  %5218 = vmatprep.subr.bf16.mxu1 %v5474_v43 }
 0x910   :  { %5189 = vmatmul.mubr.msk.bf16.vlgmr.msra.gmra.mrb[40].mxu0 %vm3114_vm0, %v4259_v13  ;;  %5215 = vmatmul.mubr.msk.bf16.vlgmr.msra.gmra.mrb[92].mxu1 %vm3114_vm0, %v4285_v14 }
 0x911   :  { %5193 = vmatpush3.bf16.msra.mxu0 %v5458_v15  ;;  %5219 = vmatpush3.bf16.msra.mxu1 %v5459_v16 }
 0x912   :  { %5194 = vmatprep.subr.bf16.mxu0 %v5474_v43  ;;  %5220 = vmatprep.subr.bf16.mxu1 %v5474_v43 }
 0x913   :  { %5208 = vmatprep.mubr.msk.bf16.mxu0 %vm5475_vm10, %v5474_v43  ;;  %5234 = vmatprep.mubr.msk.bf16.mxu1 %vm5475_vm10, %v5474_v43 }
 0x915   :  { %5195 = vmatpush3.bf16.msra.mxu0 %v5460_v17  ;;  %5221 = vmatpush3.bf16.msra.mxu1 %v5461_v18 }
 0x916   :  { %5196 = vmatprep.subr.bf16.mxu0 %v5474_v43  ;;  %5222 = vmatprep.subr.bf16.mxu1 %v5474_v43 }
 0x919   :  { %5197 = vmatpush3.bf16.msra.mxu0 %v5462_v19  ;;  %5223 = vmatpush3.bf16.msra.mxu1 %v5463_v20 }
 0x91a   :  { %5198 = vmatprep.subr.bf16.mxu0 %v5474_v43  ;;  %5224 = vmatprep.subr.bf16.mxu1 %v5474_v43 }
 0x91d   :  { %5199 = vmatpush3.bf16.msra.mxu0 %v5464_v21  ;;  %5225 = vmatpush3.bf16.msra.mxu1 %v5465_v22 }
 0x91e   :  { %5200 = vmatprep.subr.bf16.mxu0 %v5474_v43  ;;  %5226 = vmatprep.subr.bf16.mxu1 %v5474_v43 }
 0x921   :  { %5201 = vmatpush3.bf16.msra.mxu0 %v5466_v23  ;;  %5227 = vmatpush3.bf16.msra.mxu1 %v5467_v24 }
 0x922   :  { %5202 = vmatprep.subr.bf16.mxu0 %v5474_v43  ;;  %5228 = vmatprep.subr.bf16.mxu1 %v5474_v43 }
 0x925   :  { %5203 = vmatpush3.bf16.msra.mxu0 %v5468_v25  ;;  %5229 = vmatpush3.bf16.msra.mxu1 %v5469_v26 }
 0x926   :  { %5204 = vmatprep.subr.bf16.mxu0 %v5474_v43  ;;  %5230 = vmatprep.subr.bf16.mxu1 %v5474_v43 }
 0x929   :  { %5205 = vmatpush3.bf16.msra.mxu0 %v5470_v27  ;;  %5231 = vmatpush3.bf16.msra.mxu1 %v5471_v28 }
 0x92a   :  { %5206 = vmatprep.subr.bf16.mxu0 %v5474_v43  ;;  %5232 = vmatprep.subr.bf16.mxu1 %v5474_v43 }
 0x92d   :  { %5207 = vmatpush3.bf16.msra.mxu0 %v5472_v29  ;;  %5233 = vmatpush3.bf16.msra.mxu1 %v5473_v30 }
 0x9db   :  { %v3257_v31 = vpop.f32.mrb[36].mxu0  ;;  %v3457_v32 = vpop.f32.mrb[88].mxu1 }
 0x9dc   :  { %v3307_v33 = vadd.f32 %v6413_v1, %v3257_v31  ;;  %v5152_v34 = vpop.f32.mrb[37].mxu0  ;;  %v5184_v35 = vpop.f32.mrb[89].mxu1  ;;  %v3783_v1 = vsub.s32 0, %v3782_v52 }
 0x9dd   :  { %v3260_v36 = vpop.f32.mrb[38].mxu0  ;;  %v3460_v37 = vpop.f32.mrb[90].mxu1 }
 0x9de   :  { %v3463_v38 = vadd.f32 %v3457_v32, %v3307_v33  ;;  %v5153_v43 = vpop.f32.mrb[39].mxu0  ;;  %v5185_v39 = vpop.f32.mrb[91].mxu1  ;;  %v3784_v62 = vrot.slane %v3780_v0, %v3783_v1 }
 0x9e3   :  { %v3503_v40 = vpop.f32.mrb[40].mxu0  ;;  %v3655_v41 = vpop.f32.mrb[92].mxu1 }
 0x9e4   :  { %v3509_v42 = vpack.c.bf16 %v3503_v40, %v3503_v40  ;;  %v3661_v44 = vpack.c.bf16 %v3655_v41, %v3655_v41  ;;  %v5190_v45 = vpop.f32.mrb[41].mxu0  ;;  %v5216_v46 = vpop.f32.mrb[93].mxu1 }
 0x9e5   :  { %v3506_v47 = vpop.f32.mrb[42].mxu0  ;;  %v3658_v48 = vpop.f32.mrb[94].mxu1 }
 0x9e6   :  { %5209 = vmatmul.mubr.bf16.vlgmr.msra.gmra.mrb[44].mxu0 %v3509_v42  ;;  %v5191_v49 = vpop.f32.mrb[43].mxu0  ;;  %5235 = vmatmul.mubr.bf16.vlgmr.msra.gmra.mrb[96].mxu1 %v3661_v44  ;;  %v5217_v50 = vpop.f32.mrb[95].mxu1 }
 0xab9   :  { %v3609_v54 = vpop.f32.mrb[44].mxu0  ;;  %v3761_v55 = vpop.f32.mrb[96].mxu1 }
 0xaba   :  { %v3615_v56 = vadd.f32 %v3609_v54, %v3463_v38  ;;  %v5210_v57 = vpop.f32.mrb[45].mxu0  ;;  %v5236_v58 = vpop.f32.mrb[97].mxu1 }
 0xabb   :  { %v3612_v61 = vpop.f32.mrb[46].mxu0  ;;  %v3764_v63 = vpop.f32.mrb[98].mxu1 }
 0xabc   :  { %v3767_v2 = vadd.f32 %v3761_v55, %v3615_v56  ;;  %v5211_v3 = vpop.f32.mrb[47].mxu0  ;;  %v5237_v4 = vpop.f32.mrb[99].mxu1 }
 0xabe   :  { %v3775_v5 = vadd.f32 %v4311_v59, %v3767_v2 }
 0xac0   :  { %v3777_v60 = vmul.f32 0.01, %v3775_v5  ;;  %vm3776_vm3 = vcmp.gt.f32.partialorder %v3775_v5, 0.0 }
 0xac2   :  { %v3778_v6 = vsel %vm3776_vm3, %v3775_v5, %v3777_v60 }
 0xac3   :  { %v3785_v7 = vmul.f32 %v3784_v62, %v3778_v6 }
 0xac5   :  { %v3787_v8 = vsel %vm3786_vm4, %v3785_v7, 0.0 }
 0xac6   :  { %3788 = vadd.xlane.f32.xlu0 %v3787_v8 }
 0xb53   :  { %v3789_v10 = vpop.xlane.xlu0 %3788 }
 0xb54   :  { %v3792_v11 = vadd.f32 %v3791_v9, %v3789_v10 }
 0xb56   :  { %3794 = vst.msk [vmem:[%s6527_s17] sm:$0xf] %vm3793_vm5, %v3792_v11 }

</bundles_post_ra>
